<compile_context>
chip_gen: v5e
topology: v5e:2x2
jax: 0.10.0
libtpu: 0.0.40
codegen_flags: <defaults>
</compile_context>

<pallas_src>
import jax
import jax.numpy as jnp
from jax.experimental import pallas as pl
from jax.experimental.pallas import tpu as pltpu

# MLP layer sizes from the PyTorch module: Linear(3,256)->...->Linear(2,1)
LAYER_DIMS = [3, 256, 128, 32, 8, 4, 2, 1]


def _round_up(x, m):
    return ((x + m - 1) // m) * m


def _default_bf16_relu():
    """bf16 VPU exists on v6e / v7x; keep f32-ReLU order elsewhere (identical results)."""
    try:
        kind = jax.devices()[0].device_kind.lower()
    except Exception:
        return False
    return ("v6" in kind) or ("v7" in kind)


def _make_kernel(n_layers, bf16_relu):
    """Kernel over one batch tile; activations laid out (features, batch_tile).

    Ref layout: (x_ref, w0, w1, b1, w2, b2, ..., w_{L-1}, b_{L-1}, out_ref).
    Layer 0's bias is folded into w0 (ones row in x); the -f - c epilogue is folded
    into (w_{L-1}, b_{L-1}) by the wrapper.
    """

    def kernel(x_ref, *refs):
        out_ref = refs[-1]
        wb = refs[:-1]

        h = x_ref[...]                                   # (dim+1, tn), compute dtype
        idx = 0
        for l in range(n_layers):
            w = wb[idx][...]                             # (out, in), compute dtype
            idx += 1
            # MXU matmul with f32 accumulation.
            y = jnp.dot(w, h, preferred_element_type=jnp.float32)   # (out, tn) f32
            if l > 0:
                y = y + wb[idx][...]                     # (out, 1) f32 bias, lane bcast
                idx += 1
            if l < n_layers - 1:
                if bf16_relu and w.dtype != jnp.float32:
                    # Cast first, ReLU in bf16: half the vregs through vmax (v6e/v7x).
                    h = jnp.maximum(y.astype(w.dtype), 0)
                else:
                    h = jnp.maximum(y, 0.0).astype(w.dtype)
            else:
                out_ref[...] = y.astype(out_ref.dtype)   # lane-dense (1, tn) store

    return kernel


def ebm_forward(x, params, c, *, tn=2048, compute_dtype=jnp.bfloat16, bf16_relu=None):
    """Forward pass of EBM: log_p = -f(x) - c.

    x      : (N, dim) float32
    params : list of (W, b) in PyTorch layout, W: (out_features, in_features), b: (out,)
    c      : array of shape (1,)
    returns: (N, 1) float32
    """
    N, dim = x.shape
    n_layers = len(params)
    if bf16_relu is None:
        bf16_relu = _default_bf16_relu()

    # Pad the batch only to a multiple of 128 (lane width); waste bounded by 127 cols.
    n_pad = _round_up(N, 128)
    # Batch tile: multiple of 128, clamped to [128, 8192] and to the padded batch.
    tn = int(max(128, min(_round_up(int(tn), 128), 8192, n_pad)))
    grid = pl.cdiv(n_pad, tn)

    # Lane-dense input layout (dim+1, N_pad) with a ones row (folds layer-1 bias into
    # the matmul); cast to the MXU dtype in the wrapper to halve x DMA bytes.
    xT = x.T.astype(compute_dtype)                                   # (dim, N)
    ones_row = jnp.ones((1, N), compute_dtype)
    x_aug = jnp.concatenate([xT, ones_row], axis=0)                  # (dim+1, N)
    x_aug = jnp.pad(x_aug, ((0, 0), (0, n_pad - N)))                 # (dim+1, n_pad)

    args = [x_aug]
    in_specs = [pl.BlockSpec((dim + 1, tn), lambda i: (0, i))]
    for l, (W, b) in enumerate(params):
        out_f, in_f = W.shape
        if l == 0:
            # Fold b1 in as an extra weight column (matches the ones row of x_aug).
            Wk = jnp.concatenate([W, b[:, None]], axis=1).astype(compute_dtype)
            args.append(Wk)
            in_specs.append(pl.BlockSpec(Wk.shape, lambda i: (0, 0)))
            continue
        if l == n_layers - 1:
            # Fold  log_p = -(W h + b) - c  into  (-W) h + (-b - c).
            Wk = (-W).astype(compute_dtype)
            bk = (-b - c).astype(jnp.float32).reshape(out_f, 1)
        else:
            Wk = W.astype(compute_dtype)
            bk = b.astype(jnp.float32).reshape(out_f, 1)
        args += [Wk, bk]
        # Full-array weight/bias blocks with constant index maps: DMA'd once, reused.
        in_specs += [pl.BlockSpec((out_f, in_f), lambda i: (0, 0)),
                     pl.BlockSpec((out_f, 1), lambda i: (0, 0))]

    # Scoped-VMEM budget scaled with the tile (largest f32 intermediate is (256, tn)).
    vmem_limit_bytes = int(min(48 * 1024 * 1024, max(24 * 1024 * 1024, 4096 * tn)))

    out = pl.pallas_call(
        _make_kernel(n_layers, bf16_relu),
        out_shape=jax.ShapeDtypeStruct((1, n_pad), jnp.float32),
        grid_spec=pltpu.PrefetchScalarGridSpec(
            num_scalar_prefetch=0,
            grid=(grid,),
            in_specs=in_specs,
            out_specs=pl.BlockSpec((1, tn), lambda i: (0, i)),
        ),
        compiler_params=pltpu.CompilerParams(
            dimension_semantics=("parallel",),
            vmem_limit_bytes=vmem_limit_bytes),
    )(*args)

    return out[:, :N].T   # (N, 1)


def init_params(key, dims):
    """Deterministic init mimicking nn.Linear (uniform(-1/sqrt(in), 1/sqrt(in))),
    weights in PyTorch layout (out_features, in_features)."""
    params = []
    for i in range(len(dims) - 1):
        fan_in, fan_out = dims[i], dims[i + 1]
        key, kw, kb = jax.random.split(key, 3)
        bound = 1.0 / (fan_in ** 0.5)
        W = jax.random.uniform(kw, (fan_out, fan_in), jnp.float32, -bound, bound)
        b = jax.random.uniform(kb, (fan_out,), jnp.float32, -bound, bound)
        params.append((W, b))
    return params


def ebm_reference(x, params, c, matmul_dtype=jnp.float32):
    """Pure-JAX reference. matmul_dtype=bfloat16 emulates the kernel's MXU input cast
    (f32 accumulation, f32 bias/ReLU; layer-1 bias rounded to matmul_dtype, matching
    the kernel's bias-folded-into-matmul layer 1)."""
    h = x
    for i, (W, b) in enumerate(params):
        bb = b.astype(matmul_dtype).astype(jnp.float32) if i == 0 else b
        y = jnp.dot(h.astype(matmul_dtype), W.T.astype(matmul_dtype),
                    preferred_element_type=jnp.float32) + bb[None, :]
        h = jnp.maximum(y, 0.0) if i < len(params) - 1 else y
    return -h - c[0]


if __name__ == "__main__":
    key = jax.random.PRNGKey(0)
    key, kx, kx2 = jax.random.split(key, 3)

    dim = LAYER_DIMS[0]
    params = init_params(jax.random.PRNGKey(42), LAYER_DIMS)
    c = jnp.array([1.0], dtype=jnp.float32)   # nn.Parameter(torch.tensor([1.0]))

    def check(x, tn):
        fwd = jax.jit(lambda xx: ebm_forward(xx, params, c, tn=tn))
        out = jax.block_until_ready(fwd(x))
        assert out.shape == (x.shape[0], 1)
        # Tight check vs a reference using the same bf16 MXU inputs / f32 accumulation.
        ref_bf16 = ebm_reference(x, params, c, matmul_dtype=jnp.bfloat16)
        assert jnp.allclose(out, ref_bf16, atol=2e-3, rtol=2e-3), (
            f"max abs err vs bf16-matched ref: {jnp.max(jnp.abs(out - ref_bf16))}")
        # Loose sanity check vs the full-f32 reference (bf16 MXU inputs ~1e-2 rel err).
        ref_f32 = ebm_reference(x, params, c, matmul_dtype=jnp.float32)
        assert jnp.allclose(out, ref_f32, atol=5e-2, rtol=5e-2), (
            f"max abs err vs f32 ref: {jnp.max(jnp.abs(out - ref_f32))}")

    # Aligned case: 2 grid steps (keeps both v7x TensorCores busy).
    x1 = jax.random.normal(kx, (1024, dim), jnp.float32)
    check(x1, tn=512)

    # Ragged case: batch padded to 128, cdiv grid with a clipped boundary block.
    x2 = jax.random.normal(kx2, (300, dim), jnp.float32)
    check(x2, tn=256)

    print("KERNEL_OK")
</pallas_src>

<mosaic_0001>
module attributes {stable_mosaic.version = 11 : i64} {
  func.func @kernel(%arg0: i32, %arg1: memref<4x512xbf16, #tpu.memory_space<vmem>>, %arg2: memref<256x4xbf16, #tpu.memory_space<vmem>>, %arg3: memref<128x256xbf16, #tpu.memory_space<vmem>>, %arg4: memref<128x1xf32, #tpu.memory_space<vmem>>, %arg5: memref<32x128xbf16, #tpu.memory_space<vmem>>, %arg6: memref<32x1xf32, #tpu.memory_space<vmem>>, %arg7: memref<8x32xbf16, #tpu.memory_space<vmem>>, %arg8: memref<8x1xf32, #tpu.memory_space<vmem>>, %arg9: memref<4x8xbf16, #tpu.memory_space<vmem>>, %arg10: memref<4x1xf32, #tpu.memory_space<vmem>>, %arg11: memref<2x4xbf16, #tpu.memory_space<vmem>>, %arg12: memref<2x1xf32, #tpu.memory_space<vmem>>, %arg13: memref<1x2xbf16, #tpu.memory_space<vmem>>, %arg14: memref<1x1xf32, #tpu.memory_space<vmem>>, %arg15: memref<1x512xf32, #tpu.memory_space<vmem>>) attributes {dimension_semantics = [#tpu.dimension_semantics<parallel>], iteration_bounds = array<i64: 2>, scalar_prefetch = 0 : i64, scratch_operands = 0 : i64, tpu.core_type = #tpu.core_type<tc>, window_params = [{transform_indices = @transform_0, window_bounds = array<i64: 4, 512>}, {pipeline_mode = #tpu.pipeline_mode<synchronous>, transform_indices = @transform_1, window_bounds = array<i64: 256, 4>}, {pipeline_mode = #tpu.pipeline_mode<synchronous>, transform_indices = @transform_2, window_bounds = array<i64: 128, 256>}, {pipeline_mode = #tpu.pipeline_mode<synchronous>, transform_indices = @transform_3, window_bounds = array<i64: 128, 1>}, {pipeline_mode = #tpu.pipeline_mode<synchronous>, transform_indices = @transform_4, window_bounds = array<i64: 32, 128>}, {pipeline_mode = #tpu.pipeline_mode<synchronous>, transform_indices = @transform_5, window_bounds = array<i64: 32, 1>}, {pipeline_mode = #tpu.pipeline_mode<synchronous>, transform_indices = @transform_6, window_bounds = array<i64: 8, 32>}, {pipeline_mode = #tpu.pipeline_mode<synchronous>, transform_indices = @transform_7, window_bounds = array<i64: 8, 1>}, {pipeline_mode = #tpu.pipeline_mode<synchronous>, transform_indices = @transform_8, window_bounds = array<i64: 4, 8>}, {pipeline_mode = #tpu.pipeline_mode<synchronous>, transform_indices = @transform_9, window_bounds = array<i64: 4, 1>}, {pipeline_mode = #tpu.pipeline_mode<synchronous>, transform_indices = @transform_10, window_bounds = array<i64: 2, 4>}, {pipeline_mode = #tpu.pipeline_mode<synchronous>, transform_indices = @transform_11, window_bounds = array<i64: 2, 1>}, {pipeline_mode = #tpu.pipeline_mode<synchronous>, transform_indices = @transform_12, window_bounds = array<i64: 1, 2>}, {pipeline_mode = #tpu.pipeline_mode<synchronous>, transform_indices = @transform_13, window_bounds = array<i64: 1, 1>}, {transform_indices = @transform_14, window_bounds = array<i64: 1, 512>}]} {
    %c0 = arith.constant 0 : index
    %c0_0 = arith.constant 0 : index
    %0 = vector.load %arg1[%c0, %c0_0] : memref<4x512xbf16, #tpu.memory_space<vmem>>, vector<4x512xbf16>
    %c0_1 = arith.constant 0 : index
    %c0_2 = arith.constant 0 : index
    %1 = vector.load %arg2[%c0_1, %c0_2] : memref<256x4xbf16, #tpu.memory_space<vmem>>, vector<256x4xbf16>
    %cst = arith.constant dense<0.000000e+00> : vector<256x512xf32>
    %2 = tpu.matmul %1, %0, %cst {dimension_numbers = #tpu.dot_dimension_numbers<[1], [0], [0], [1], [0, 0, 1, 1], [], []>} : vector<256x4xbf16>, vector<4x512xbf16>, vector<256x512xf32> -> vector<256x512xf32>
    %cst_3 = arith.constant 0.000000e+00 : f32
    %3 = vector.broadcast %cst_3 : f32 to vector<256x512xf32>
    %4 = arith.maximumf %2, %3 : vector<256x512xf32>
    %5 = arith.truncf %4 : vector<256x512xf32> to vector<256x512xbf16>
    %c0_4 = arith.constant 0 : index
    %c0_5 = arith.constant 0 : index
    %6 = vector.load %arg3[%c0_4, %c0_5] : memref<128x256xbf16, #tpu.memory_space<vmem>>, vector<128x256xbf16>
    %cst_6 = arith.constant dense<0.000000e+00> : vector<128x512xf32>
    %7 = tpu.matmul %6, %5, %cst_6 {dimension_numbers = #tpu.dot_dimension_numbers<[1], [0], [0], [1], [0, 0, 1, 1], [], []>} : vector<128x256xbf16>, vector<256x512xbf16>, vector<128x512xf32> -> vector<128x512xf32>
    %c0_7 = arith.constant 0 : index
    %c0_8 = arith.constant 0 : index
    %8 = vector.load %arg4[%c0_7, %c0_8] : memref<128x1xf32, #tpu.memory_space<vmem>>, vector<128x1xf32>
    %9 = vector.broadcast %8 : vector<128x1xf32> to vector<128x512xf32>
    %10 = arith.addf %7, %9 : vector<128x512xf32>
    %cst_9 = arith.constant 0.000000e+00 : f32
    %11 = vector.broadcast %cst_9 : f32 to vector<128x512xf32>
    %12 = arith.maximumf %10, %11 : vector<128x512xf32>
    %13 = arith.truncf %12 : vector<128x512xf32> to vector<128x512xbf16>
    %c0_10 = arith.constant 0 : index
    %c0_11 = arith.constant 0 : index
    %14 = vector.load %arg5[%c0_10, %c0_11] : memref<32x128xbf16, #tpu.memory_space<vmem>>, vector<32x128xbf16>
    %cst_12 = arith.constant dense<0.000000e+00> : vector<32x512xf32>
    %15 = tpu.matmul %14, %13, %cst_12 {dimension_numbers = #tpu.dot_dimension_numbers<[1], [0], [0], [1], [0, 0, 1, 1], [], []>} : vector<32x128xbf16>, vector<128x512xbf16>, vector<32x512xf32> -> vector<32x512xf32>
    %c0_13 = arith.constant 0 : index
    %c0_14 = arith.constant 0 : index
    %16 = vector.load %arg6[%c0_13, %c0_14] : memref<32x1xf32, #tpu.memory_space<vmem>>, vector<32x1xf32>
    %17 = vector.broadcast %16 : vector<32x1xf32> to vector<32x512xf32>
    %18 = arith.addf %15, %17 : vector<32x512xf32>
    %cst_15 = arith.constant 0.000000e+00 : f32
    %19 = vector.broadcast %cst_15 : f32 to vector<32x512xf32>
    %20 = arith.maximumf %18, %19 : vector<32x512xf32>
    %21 = arith.truncf %20 : vector<32x512xf32> to vector<32x512xbf16>
    %c0_16 = arith.constant 0 : index
    %c0_17 = arith.constant 0 : index
    %22 = vector.load %arg7[%c0_16, %c0_17] : memref<8x32xbf16, #tpu.memory_space<vmem>>, vector<8x32xbf16>
    %cst_18 = arith.constant dense<0.000000e+00> : vector<8x512xf32>
    %23 = tpu.matmul %22, %21, %cst_18 {dimension_numbers = #tpu.dot_dimension_numbers<[1], [0], [0], [1], [0, 0, 1, 1], [], []>} : vector<8x32xbf16>, vector<32x512xbf16>, vector<8x512xf32> -> vector<8x512xf32>
    %c0_19 = arith.constant 0 : index
    %c0_20 = arith.constant 0 : index
    %24 = vector.load %arg8[%c0_19, %c0_20] : memref<8x1xf32, #tpu.memory_space<vmem>>, vector<8x1xf32>
    %25 = vector.broadcast %24 : vector<8x1xf32> to vector<8x512xf32>
    %26 = arith.addf %23, %25 : vector<8x512xf32>
    %cst_21 = arith.constant 0.000000e+00 : f32
    %27 = vector.broadcast %cst_21 : f32 to vector<8x512xf32>
    %28 = arith.maximumf %26, %27 : vector<8x512xf32>
    %29 = arith.truncf %28 : vector<8x512xf32> to vector<8x512xbf16>
    %c0_22 = arith.constant 0 : index
    %c0_23 = arith.constant 0 : index
    %30 = vector.load %arg9[%c0_22, %c0_23] : memref<4x8xbf16, #tpu.memory_space<vmem>>, vector<4x8xbf16>
    %cst_24 = arith.constant dense<0.000000e+00> : vector<4x512xf32>
    %31 = tpu.matmul %30, %29, %cst_24 {dimension_numbers = #tpu.dot_dimension_numbers<[1], [0], [0], [1], [0, 0, 1, 1], [], []>} : vector<4x8xbf16>, vector<8x512xbf16>, vector<4x512xf32> -> vector<4x512xf32>
    %c0_25 = arith.constant 0 : index
    %c0_26 = arith.constant 0 : index
    %32 = vector.load %arg10[%c0_25, %c0_26] : memref<4x1xf32, #tpu.memory_space<vmem>>, vector<4x1xf32>
    %33 = vector.broadcast %32 : vector<4x1xf32> to vector<4x512xf32>
    %34 = arith.addf %31, %33 : vector<4x512xf32>
    %cst_27 = arith.constant 0.000000e+00 : f32
    %35 = vector.broadcast %cst_27 : f32 to vector<4x512xf32>
    %36 = arith.maximumf %34, %35 : vector<4x512xf32>
    %37 = arith.truncf %36 : vector<4x512xf32> to vector<4x512xbf16>
    %c0_28 = arith.constant 0 : index
    %c0_29 = arith.constant 0 : index
    %38 = vector.load %arg11[%c0_28, %c0_29] : memref<2x4xbf16, #tpu.memory_space<vmem>>, vector<2x4xbf16>
    %cst_30 = arith.constant dense<0.000000e+00> : vector<2x512xf32>
    %39 = tpu.matmul %38, %37, %cst_30 {dimension_numbers = #tpu.dot_dimension_numbers<[1], [0], [0], [1], [0, 0, 1, 1], [], []>} : vector<2x4xbf16>, vector<4x512xbf16>, vector<2x512xf32> -> vector<2x512xf32>
    %c0_31 = arith.constant 0 : index
    %c0_32 = arith.constant 0 : index
    %40 = vector.load %arg12[%c0_31, %c0_32] : memref<2x1xf32, #tpu.memory_space<vmem>>, vector<2x1xf32>
    %41 = vector.broadcast %40 : vector<2x1xf32> to vector<2x512xf32>
    %42 = arith.addf %39, %41 : vector<2x512xf32>
    %cst_33 = arith.constant 0.000000e+00 : f32
    %43 = vector.broadcast %cst_33 : f32 to vector<2x512xf32>
    %44 = arith.maximumf %42, %43 : vector<2x512xf32>
    %45 = arith.truncf %44 : vector<2x512xf32> to vector<2x512xbf16>
    %c0_34 = arith.constant 0 : index
    %c0_35 = arith.constant 0 : index
    %46 = vector.load %arg13[%c0_34, %c0_35] : memref<1x2xbf16, #tpu.memory_space<vmem>>, vector<1x2xbf16>
    %cst_36 = arith.constant dense<0.000000e+00> : vector<1x512xf32>
    %47 = tpu.matmul %46, %45, %cst_36 {dimension_numbers = #tpu.dot_dimension_numbers<[1], [0], [0], [1], [0, 0, 1, 1], [], []>} : vector<1x2xbf16>, vector<2x512xbf16>, vector<1x512xf32> -> vector<1x512xf32>
    %c0_37 = arith.constant 0 : index
    %c0_38 = arith.constant 0 : index
    %48 = vector.load %arg14[%c0_37, %c0_38] : memref<1x1xf32, #tpu.memory_space<vmem>>, vector<1x1xf32>
    %49 = vector.broadcast %48 : vector<1x1xf32> to vector<1x512xf32>
    %50 = arith.addf %47, %49 : vector<1x512xf32>
    %c0_39 = arith.constant 0 : index
    %c0_40 = arith.constant 0 : index
    %51 = vector.load %arg15[%c0_39, %c0_40] : memref<1x512xf32, #tpu.memory_space<vmem>>, vector<1x512xf32>
    tpu.vector_store %arg15[%c0_39, %c0_40], %50 {strides = array<i32>} : memref<1x512xf32, #tpu.memory_space<vmem>>, vector<1x512xf32>,
    return
  }
  func.func @transform_0(%arg0: i32) -> (i32, i32) {
    %c0_i32 = arith.constant 0 : i32
    %c0_i32_0 = arith.constant 0 : i32
    return %c0_i32, %arg0 : i32, i32
  }
  func.func @transform_1(%arg0: i32) -> (i32, i32) {
    %c0_i32 = arith.constant 0 : i32
    %c0_i32_0 = arith.constant 0 : i32
    %c0_i32_1 = arith.constant 0 : i32
    return %c0_i32, %c0_i32_0 : i32, i32
  }
  func.func @transform_2(%arg0: i32) -> (i32, i32) {
    %c0_i32 = arith.constant 0 : i32
    %c0_i32_0 = arith.constant 0 : i32
    %c0_i32_1 = arith.constant 0 : i32
    return %c0_i32, %c0_i32_0 : i32, i32
  }
  func.func @transform_3(%arg0: i32) -> (i32, i32) {
    %c0_i32 = arith.constant 0 : i32
    %c0_i32_0 = arith.constant 0 : i32
    %c0_i32_1 = arith.constant 0 : i32
    return %c0_i32, %c0_i32_0 : i32, i32
  }
  func.func @transform_4(%arg0: i32) -> (i32, i32) {
    %c0_i32 = arith.constant 0 : i32
    %c0_i32_0 = arith.constant 0 : i32
    %c0_i32_1 = arith.constant 0 : i32
    return %c0_i32, %c0_i32_0 : i32, i32
  }
  func.func @transform_5(%arg0: i32) -> (i32, i32) {
    %c0_i32 = arith.constant 0 : i32
    %c0_i32_0 = arith.constant 0 : i32
    %c0_i32_1 = arith.constant 0 : i32
    return %c0_i32, %c0_i32_0 : i32, i32
  }
  func.func @transform_6(%arg0: i32) -> (i32, i32) {
    %c0_i32 = arith.constant 0 : i32
    %c0_i32_0 = arith.constant 0 : i32
    %c0_i32_1 = arith.constant 0 : i32
    return %c0_i32, %c0_i32_0 : i32, i32
  }
  func.func @transform_7(%arg0: i32) -> (i32, i32) {
    %c0_i32 = arith.constant 0 : i32
    %c0_i32_0 = arith.constant 0 : i32
    %c0_i32_1 = arith.constant 0 : i32
    return %c0_i32, %c0_i32_0 : i32, i32
  }
  func.func @transform_8(%arg0: i32) -> (i32, i32) {
    %c0_i32 = arith.constant 0 : i32
    %c0_i32_0 = arith.constant 0 : i32
    %c0_i32_1 = arith.constant 0 : i32
    return %c0_i32, %c0_i32_0 : i32, i32
  }
  func.func @transform_9(%arg0: i32) -> (i32, i32) {
    %c0_i32 = arith.constant 0 : i32
    %c0_i32_0 = arith.constant 0 : i32
    %c0_i32_1 = arith.constant 0 : i32
    return %c0_i32, %c0_i32_0 : i32, i32
  }
  func.func @transform_10(%arg0: i32) -> (i32, i32) {
    %c0_i32 = arith.constant 0 : i32
    %c0_i32_0 = arith.constant 0 : i32
    %c0_i32_1 = arith.constant 0 : i32
    return %c0_i32, %c0_i32_0 : i32, i32
  }
  func.func @transform_11(%arg0: i32) -> (i32, i32) {
    %c0_i32 = arith.constant 0 : i32
    %c0_i32_0 = arith.constant 0 : i32
    %c0_i32_1 = arith.constant 0 : i32
    return %c0_i32, %c0_i32_0 : i32, i32
  }
  func.func @transform_12(%arg0: i32) -> (i32, i32) {
    %c0_i32 = arith.constant 0 : i32
    %c0_i32_0 = arith.constant 0 : i32
    %c0_i32_1 = arith.constant 0 : i32
    return %c0_i32, %c0_i32_0 : i32, i32
  }
  func.func @transform_13(%arg0: i32) -> (i32, i32) {
    %c0_i32 = arith.constant 0 : i32
    %c0_i32_0 = arith.constant 0 : i32
    %c0_i32_1 = arith.constant 0 : i32
    return %c0_i32, %c0_i32_0 : i32, i32
  }
  func.func @transform_14(%arg0: i32) -> (i32, i32) {
    %c0_i32 = arith.constant 0 : i32
    %c0_i32_0 = arith.constant 0 : i32
    return %c0_i32, %arg0 : i32, i32
  }
}

</mosaic_0001>

<bundles_post_ra>
// kernel: _lambda_.1
= control target key start
LH: loop header
LB: loop body
LE: loop exit
PB: predicated region body
PF: predicated region fallthrough
CT: control target
= control target key end

     0   :  { %s4041_s0 = inlined_call_operand.vmem [shape: bf16[4,1024], index: 0, kind: input, shape index: {}]   ;;  %s4042_s1 = inlined_call_operand.hbm [shape: bf16[256,4], index: 1, kind: input, shape index: {}]   ;;  %s4043_s2 = inlined_call_operand.hbm [shape: bf16[128,256], index: 2, kind: input, shape index: {}]   ;;  %s4044_s3 = inlined_call_operand.hbm [shape: f32[128,1], index: 3, kind: input, shape index: {}]   ;;  %s4045_s4 = inlined_call_operand.vmem [shape: bf16[32,128], index: 4, kind: input, shape index: {}]   ;;  %s4046_s5 = inlined_call_operand.vmem [shape: f32[32,1], index: 5, kind: input, shape index: {}]   ;;  %s4047_s6 = inlined_call_operand.vmem [shape: bf16[8,32], index: 6, kind: input, shape index: {}]   ;;  %s4048_s7 = inlined_call_operand.vmem [shape: f32[8,1], index: 7, kind: input, shape index: {}]   ;;  %s4049_s8 = inlined_call_operand.vmem [shape: bf16[4,8], index: 8, kind: input, shape index: {}]   ;;  %s4050_s9 = inlined_call_operand.vmem [shape: f32[4,1], index: 9, kind: input, shape index: {}]   ;;  %s4051_s10 = inlined_call_operand.vmem [shape: bf16[2,4], index: 10, kind: input, shape index: {}]   ;;  %s4052_s11 = inlined_call_operand.vmem [shape: f32[2,1], index: 11, kind: input, shape index: {}]   ;;  %s4053_s12 = inlined_call_operand.vmem [shape: bf16[1,2], index: 12, kind: input, shape index: {}]   ;;  %s4054_s13 = inlined_call_operand.<no memory space> [shape: f32[1,1], index: 13, kind: input, shape index: {}]   ;;  %s4055_s14 = inlined_call_operand.hbm [shape: f32[1,1024], index: 14, kind: output, shape index: {}]  }
   0x1   :  { %4074 = sst [smem:[#allocation30_spill]] %s4042_s1  ;;  %v19_v0 = vstv %s4054_s13 }
   0x2   :  { %4075 = sst [smem:[#allocation31_spill]] %s4043_s2  ;;  %20 = vst [vmem:[#allocation2] sm:$0x1] %v19_v0 }
   0x3   :  { %21 = vsyncpa [#allocation4], 0 }
   0x4   :  { %22 = vsyncpa [#allocation7], 0 }
   0x5   :  { %23 = vsyncpa [#allocation5], 0 }
   0x6   :  { %25 = vsyncpa [#allocation5 + $0x1], 0  ;;  %s3097_s15 = smov 0   ;;  %s3099_s16 = smov 0  }
   0x7   :  { %s3101_s17 = smov 0   ;;  %s3103_s18 = smov 0  }
   0x8 LB: > { %4076 = sst [smem:[#allocation13_spill]] %s2997_s15  ;;  %s3118_s13 = sadd.s32 4294967295, %s3009_s18   ;;  %s3009_s18 = sphi %s3103_s18, %s4127_s18   ;;  %s3005_s17 = sphi %s3101_s17, %s4129_s17   ;;  %s3001_s16 = sphi %s3099_s16, %s4131_s16   ;;  %s2997_s15 = sphi %s3097_s15, %s4130_s15  }
   0x9   : > { %4077 = sst [smem:[#allocation14_spill]] %s3005_s17  ;;  %s2504_s19 = sadd.s32 4294967294, %s3009_s18  }
   0xa   : > { %4078 = sst [smem:[#allocation15_spill]] %s3009_s18  ;;  %s3122_s20 = sadd.s32 1, %s3009_s18  }
   0xb   : > { %4079 = sst [smem:[#allocation16_spill]] %s3122_s20  ;;  %s337_s21 = sadd.s32 1, %s3005_s17 }
   0xc   : > { %s334_s22 = ssub.s32 %s3009_s18, %s3122_s20  ;;  %p347_p0 = scmp.ne.s32.totalorder %s3005_s17, %s3001_s16 }
   0xd   : > { %p335_p1 = scmp.eq.s32.totalorder %s334_s22, 0  ;;  %p348_p2 = scmp.eq.s32.totalorder %s3118_s13, 1 }
   0xe   : > { %p353_p3 = scmp.ne.s32.totalorder %s3001_s16, %s2997_s15  ;;  %p354_p4 = scmp.eq.s32.totalorder %s2504_s19, 1 }
   0xf   : > { %s3133_s23 = scalar_select %p335_p1, %s3005_s17, %s337_s21  }
  0x10   : > { %p3135_p5 = por %p348_p2, %p347_p0  ;;  %p3139_p6 = por %p354_p4, %p353_p3 }
  0x11   : > { %4080 = sst [smem:[#allocation17_spill]] %s3133_s23  ;;  %p2505_p7 = scmp.ge.s32.totalorder %s3009_s18, 1 }
  0x12   : > { %s4082_s25 = scalar_select %p3139_p6, 1, 0 }
  0x13   : > { %p361_p8 = scmp.lt.s32.totalorder %s3009_s18, 3  ;;  %p2799_p9 = scmp.eq.s32.totalorder %s3118_s13, 0 }
  0x14   : > { %4083 = sst [smem:[#allocation18_spill]] %s4082_s25  ;;  %s3011_s30 = smov [#allocation6]  }
  0x15   : > { %p3146_p10 = pnand %p2505_p7, %p361_p8  ;;  %s4085_s2 = sld [smem:[#allocation31_spill]] }
  0x16   : > { %s388_s19 = sshll.u32 %s3011_s30, 4  ;;  %s4087_s1 = sld [smem:[#allocation30_spill]]  ;;  %s389_s19 = int_to_ptr.vmem [resolvable:$true] %s388_s19 }
  0x17   : > { %p2785_p11 = pneg %p3146_p10  ;;  %s3012_s27 = smov 128  }
  0x18   : > { %s3013_s28 = smov 8   ;;  %s3015_s20 = smov 64  }
  0x19   : > { %p3157_p12 = pnand %p2799_p9, %p2785_p11  ;;  %s3016_s25 = smov 4  }
  0x1a   : > { %s400_s23 = sshll.u32 %s4044_s3, 4  ;;  %s3017_s22 = smov [#allocation8]   ;;  %s401_s23 = int_to_ptr.hbm [resolvable:$true] %s400_s23 }
  0x1b   : > { %s386_s29 = sshll.u32 %s4085_s2, 4  ;;  %s3014_s2 = smov [#allocation3]   ;;  %s387_s29 = int_to_ptr.hbm [resolvable:$true] %s386_s29 }
  0x1c   : > { %s372_s17 = sshll.u32 %s4087_s1, 4  ;;  %s374_s30 = sshll.u32 %s3014_s2, 4  ;;  %s373_s17 = int_to_ptr.hbm [resolvable:$true] %s372_s17  ;;  %s375_s30 = int_to_ptr.vmem [resolvable:$true] %s374_s30 }
  0x1d   : > { %2791 = dma.hbm_to_vmem [thread:$0]  (!%p3157_p12), %s387_s29, 2048, %s389_s19, [#allocation7], %s3012_s27, %s3012_s27, %s3013_s28  }
  0x1e   : > { %2788 = dma.hbm_to_vmem [thread:$0]  (!%p3157_p12), %s373_s17, 2048, %s375_s30, [#allocation4], %s3015_s20, %s3015_s20, %s3016_s25  }
  0x1f   : > { %s402_s1 = sshll.u32 %s3017_s22, 4  ;;  %457 = sbr.rel (%p3146_p10) target bundleno = 1622 (0x656), region = 76  ;;  %s403_s1 = int_to_ptr.vmem [resolvable:$true] %s402_s1 }
  0x20   : > { %2794 = dma.hbm_to_vmem [thread:$0]  (!%p3157_p12), %s401_s23, 2048, %s403_s1, [#allocation7], %s3012_s27, %s3012_s27, %s3013_s28  }
  0x24   : > { %2984 = dma.done.wait (%p2799_p9), [#allocation4], 2048  }
  0x25   : > { %2986 = vsyncadd (%p2799_p9), [#allocation4], 4294965248 }
  0x26   : > { %2988 = dma.done.wait (%p2799_p9), [#allocation7], 4096  }
  0x27   : > { %2990 = vsyncadd (%p2799_p9), [#allocation7], 4294963200  ;;  %s3184_s2 = sshll.u32 %s3118_s13, 2  ;;  %vm690_vm0 = vcmask 1041408   ;;  %v2737_v6 = vld [vmem:[#allocation3] sm:$0xff]  ;;  %vm641_vm1 = vcmask 31744  }
  0x28   : > { %p515_p13 = scmp.lt.s32.totalorder %s3184_s2, 7  ;;  %v2738_v11 = vld [vmem:[#allocation3 + $0x8] sm:$0xff]  ;;  %v2739_v12 = vld [vmem:[#allocation3 + $0x10] sm:$0xff]  ;;  %v2740_v13 = vld [vmem:[#allocation3 + $0x18] sm:$0xff]  ;;  %vm2074_vm2 = vcmask 261120   ;;  %vm2149_vm3 = vcmask 1043456   ;;  %s2409_s18 = scalar_lea.hbm %s4055_s14, %s3184_s2 }
  0x29   : > { %v2741_v14 = vld [vmem:[#allocation3 + $0x20] sm:$0xff]  ;;  %v2742_v15 = vld [vmem:[#allocation3 + $0x28] sm:$0xff]  ;;  %v2743_v16 = vld [vmem:[#allocation3 + $0x30] sm:$0xff]  ;;  %vm2145_vm4 = vcmask 64512   ;;  %vm2316_vm5 = vcmask 1040384   ;;  %vm2312_vm6 = vcmask 15360  }
  0x2a   : > { %s516_s1 = scalar_select %p515_p13, %s3184_s2, 7  ;;  %v2744_v17 = vld [vmem:[#allocation3 + $0x38] sm:$0xff]  ;;  %v2745_v18 = vld [vmem:[#allocation3 + $0x40] sm:$0xff]  ;;  %v2746_v31 = vld [vmem:[#allocation3 + $0x48] sm:$0xff]  ;;  %vm2389_vm7 = vcmask 1042434  }
  0x2b   : > { %v2747_v46 = vld [vmem:[#allocation3 + $0x50] sm:$0xff]  ;;  %v2748_v61 = vld [vmem:[#allocation3 + $0x58] sm:$0xff]  ;;  %s511_s22 = sand.u32 1, %s3001_s16   ;;  %s2413_s25 = sshll.u32 %s2409_s18, 4  ;;  %s2414_s25 = int_to_ptr.hbm [resolvable:$true] %s2413_s25 }
  0x2c   : > { %s2516_s15 = sshll.u32 %s516_s1, 1  ;;  %s2514_s1 = sshll.u32 %s511_s22, 2 }
  0x2d   : > { %s518_s20 = scalar_lea.vmem %s4041_s0, %s2516_s15  ;;  %s2399_s2 = scalar_lea.sflag [#allocation5], %s511_s22 }
  0x2e   : > { %v522_v1 = vld [vmem:[%s518_s20] sm:$0xff]  ;;  %s513_s20 = scalar_lea.vmem [#allocation9], %s2514_s1  ;;  %s2953_s26 = sshra.s32 %s2414_s25, 4  ;;  %s2954_s26 = int_to_ptr.hbm [resolvable:$true] %s2953_s26 }
  0x2f   : > { %636 = vst [vmem:[#allocation1] ss:$4 sm:$0xff] %v522_v1  ;;  %s2411_s13 = sshll.u32 %s513_s20, 4  ;;  %s2955_s29 = scalar_lea.hbm %s2954_s26, 4  ;;  %s2412_s13 = int_to_ptr.vmem [resolvable:$true] %s2411_s13 }
  0x30   : > { %p2956_p0 = scmp.ne.s32.totalorder %s2954_s26, %s2955_s29  ;;  %s2959_s27 = scalar_lea.hbm %s4055_s14, 8 }
  0x31   : > { %p2960_p3 = scmp.lt.s32.totalorder %s2954_s26, %s4055_s14  ;;  %p2961_p4 = scmp.lt.s32.totalorder %s2959_s27, %s2955_s29 }
  0x32   : > { %p2957_p1 = pnand %p2956_p0, %p3135_p5 }
  0x33   : > { %p2962_p7 = por %p2961_p4, %p2960_p3 }
  0x34   : > { %p2958_p2 = pneg %p2957_p1 }
  0x36   : > { %v637_v2 = vld.sshfl [vmem:[#allocation1] sm:$0xff pattern:$0x73625140]  ;;  %v638_v3 = vld.sshfl [vmem:[#allocation1 + $0x8] sm:$0xff pattern:$0x73625140]  ;;  %p2963_p8 = pnand %p2962_p7, %p2958_p2 }
  0x37   : > { %v691_v4 = vsel %vm690_vm0, %v637_v2, 0  ;;  %v693_v5 = vsel %vm690_vm0, %v638_v3, 0  ;;  %v640_v7 = vld.sshfl [vmem:[#allocation1 + $0x18] sm:$0xff pattern:$0x73625140] }
  0x38   : > { %706 = vmatpush.bf16.msra.mxu0 %v691_v4  ;;  %795 = vmatpush.bf16.msra.mxu1 %v693_v5  ;;  %v697_v8 = vsel %vm690_vm0, %v640_v7, 0  ;;  %v639_v9 = vld.sshfl [vmem:[#allocation1 + $0x10] sm:$0xff pattern:$0x73625140] }
  0x39   : > { %973 = vmatpush.bf16.msra.mxu3 %v697_v8  ;;  %v695_v10 = vsel %vm690_vm0, %v639_v9, 0 }
  0x3a   : > { %884 = vmatpush.bf16.msra.mxu2 %v695_v10 }
  0x3b   : > { %2581 = vmatmul.msk.bf16.vlgmr.msra.gmra.mxu0 %vm641_vm1, %v2737_v6  ;;  %2597 = vmatmul.msk.bf16.vlgmr.msra.gmra.mxu1 %vm641_vm1, %v2737_v6 }
  0x3c   : > { %2629 = vmatmul.msk.bf16.vlgmr.msra.gmra.mxu3 %vm641_vm1, %v2737_v6 }
  0x3d   : > { %2613 = vmatmul.msk.bf16.vlgmr.msra.gmra.mxu2 %vm641_vm1, %v2737_v6 }
  0x4b   : > { %2582 = vmatmul.msk.bf16.gmra.mxu0 %vm641_vm1, %v2738_v11  ;;  %2598 = vmatmul.msk.bf16.gmra.mxu1 %vm641_vm1, %v2738_v11 }
  0x4c   : > { %2630 = vmatmul.msk.bf16.gmra.mxu3 %vm641_vm1, %v2738_v11 }
  0x4d   : > { %2614 = vmatmul.msk.bf16.gmra.mxu2 %vm641_vm1, %v2738_v11 }
  0x5b   : > { %2583 = vmatmul.msk.bf16.gmra.mxu0 %vm641_vm1, %v2739_v12  ;;  %2599 = vmatmul.msk.bf16.gmra.mxu1 %vm641_vm1, %v2739_v12 }
  0x5c   : > { %2631 = vmatmul.msk.bf16.gmra.mxu3 %vm641_vm1, %v2739_v12 }
  0x5d   : > { %2615 = vmatmul.msk.bf16.gmra.mxu2 %vm641_vm1, %v2739_v12  ;;  %v2749_v12 = vld [vmem:[#allocation3 + $0x60] sm:$0xff] }
  0x6b   : > { %2584 = vmatmul.msk.bf16.gmra.mxu0 %vm641_vm1, %v2740_v13  ;;  %2600 = vmatmul.msk.bf16.gmra.mxu1 %vm641_vm1, %v2740_v13 }
  0x6c   : > { %2632 = vmatmul.msk.bf16.gmra.mxu3 %vm641_vm1, %v2740_v13 }
  0x6d   : > { %2616 = vmatmul.msk.bf16.gmra.mxu2 %vm641_vm1, %v2740_v13 }
  0x7b   : > { %2585 = vmatmul.msk.bf16.gmra.mxu0 %vm641_vm1, %v2741_v14  ;;  %2601 = vmatmul.msk.bf16.gmra.mxu1 %vm641_vm1, %v2741_v14 }
  0x7c   : > { %2633 = vmatmul.msk.bf16.gmra.mxu3 %vm641_vm1, %v2741_v14 }
  0x7d   : > { %2617 = vmatmul.msk.bf16.gmra.mxu2 %vm641_vm1, %v2741_v14 }
  0x8b   : > { %2586 = vmatmul.msk.bf16.gmra.mxu0 %vm641_vm1, %v2742_v15  ;;  %2602 = vmatmul.msk.bf16.gmra.mxu1 %vm641_vm1, %v2742_v15 }
  0x8c   : > { %2634 = vmatmul.msk.bf16.gmra.mxu3 %vm641_vm1, %v2742_v15 }
  0x8d   : > { %2618 = vmatmul.msk.bf16.gmra.mxu2 %vm641_vm1, %v2742_v15 }
  0x9b   : > { %2587 = vmatmul.msk.bf16.gmra.mxu0 %vm641_vm1, %v2743_v16  ;;  %2603 = vmatmul.msk.bf16.gmra.mxu1 %vm641_vm1, %v2743_v16 }
  0x9c   : > { %2635 = vmatmul.msk.bf16.gmra.mxu3 %vm641_vm1, %v2743_v16 }
  0x9d   : > { %2619 = vmatmul.msk.bf16.gmra.mxu2 %vm641_vm1, %v2743_v16 }
  0xab   : > { %2588 = vmatmul.msk.bf16.gmra.mxu0 %vm641_vm1, %v2744_v17  ;;  %2604 = vmatmul.msk.bf16.gmra.mxu1 %vm641_vm1, %v2744_v17 }
  0xac   : > { %2636 = vmatmul.msk.bf16.gmra.mxu3 %vm641_vm1, %v2744_v17 }
  0xad   : > { %2620 = vmatmul.msk.bf16.gmra.mxu2 %vm641_vm1, %v2744_v17 }
  0xb8   : > { %v708_v19 = vpop.f32.mrf.mxu0  ;;  %v797_v20 = vpop.f32.mrf.mxu1 }
  0xb9   : > { %v1055_v24 = vmax.f32 %v708_v19, 0.0  ;;  %v1056_v25 = vmax.f32 %v797_v20, 0.0 }
  0xbb   : > { %2589 = vmatmul.msk.bf16.gmra.mxu0 %vm641_vm1, %v2745_v18  ;;  %2605 = vmatmul.msk.bf16.gmra.mxu1 %vm641_vm1, %v2745_v18 }
  0xbc   : > { %2637 = vmatmul.msk.bf16.gmra.mxu3 %vm641_vm1, %v2745_v18 }
  0xbd   : > { %2621 = vmatmul.msk.bf16.gmra.mxu2 %vm641_vm1, %v2745_v18 }
  0xbf   : > { %v3231_v21 = vpop.f32.mrf.mxu3 }
  0xc0   : > { %v710_v22 = vpop.f32.mrf.mxu0  ;;  %v799_v23 = vpop.f32.mrf.mxu1 }
  0xc1   : > { %v1059_v26 = vmax.f32 %v710_v22, 0.0  ;;  %v1060_v27 = vmax.f32 %v799_v23, 0.0  ;;  %v3233_v28 = vpop.f32.mrf.mxu2  ;;  %v2750_v22 = vld [vmem:[#allocation3 + $0x68] sm:$0xff] }
  0xc3   : > { %v3235_v29 = vpack.c.bf16 %v1059_v26, %v1055_v24  ;;  %v3237_v30 = vpack.c.bf16 %v1060_v27, %v1056_v25  ;;  %v1058_v26 = vmax.f32 %v3231_v21, 0.0 }
  0xc7   : > { %v3239_v32 = vpop.f32.mrf.mxu3 }
  0xc8   : > { %v713_v33 = vpop.f32.mrf.mxu0  ;;  %v802_v34 = vpop.f32.mrf.mxu1 }
  0xc9   : > { %v3241_v35 = vpop.f32.mrf.mxu2  ;;  %v1063_v39 = vmax.f32 %v713_v33, 0.0  ;;  %v1064_v40 = vmax.f32 %v802_v34, 0.0  ;;  %v1057_v34 = vmax.f32 %v3233_v28, 0.0 }
  0xcb   : > { %2590 = vmatmul.msk.bf16.gmra.mxu0 %vm641_vm1, %v2746_v31  ;;  %2606 = vmatmul.msk.bf16.gmra.mxu1 %vm641_vm1, %v2746_v31 }
  0xcc   : > { %2638 = vmatmul.msk.bf16.gmra.mxu3 %vm641_vm1, %v2746_v31 }
  0xcd   : > { %2622 = vmatmul.msk.bf16.gmra.mxu2 %vm641_vm1, %v2746_v31  ;;  %v1062_v31 = vmax.f32 %v3239_v32, 0.0  ;;  %v2751_v32 = vld [vmem:[#allocation3 + $0x70] sm:$0xff] }
  0xcf   : > { %v3247_v36 = vpop.f32.mrf.mxu3  ;;  %v3320_v33 = vpack.c.bf16 %v1062_v31, %v1058_v26 }
  0xd0   : > { %v715_v37 = vpop.f32.mrf.mxu0  ;;  %v804_v38 = vpop.f32.mrf.mxu1 }
  0xd1   : > { %v1067_v41 = vmax.f32 %v715_v37, 0.0  ;;  %v1068_v42 = vmax.f32 %v804_v38, 0.0  ;;  %v3249_v43 = vpop.f32.mrf.mxu2 }
  0xd3   : > { %v3251_v44 = vpack.c.bf16 %v1067_v41, %v1063_v39  ;;  %v3253_v45 = vpack.c.bf16 %v1068_v42, %v1064_v40  ;;  %v1061_v39 = vmax.f32 %v3241_v35, 0.0  ;;  %v1066_v42 = vmax.f32 %v3247_v36, 0.0 }
  0xd4   : > { %v1065_v36 = vmax.f32 %v3249_v43, 0.0 }
  0xd5   : > { %v3333_v41 = vpack.c.bf16 %v1061_v39, %v1057_v34 }
  0xd7   : > { %v3255_v47 = vpop.f32.mrf.mxu3 }
  0xd8   : > { %v718_v48 = vpop.f32.mrf.mxu0  ;;  %v807_v49 = vpop.f32.mrf.mxu1  ;;  %v1070_v28 = vmax.f32 %v3255_v47, 0.0 }
  0xd9   : > { %v3257_v50 = vpop.f32.mrf.mxu2  ;;  %v1071_v54 = vmax.f32 %v718_v48, 0.0  ;;  %v1072_v55 = vmax.f32 %v807_v49, 0.0 }
  0xda   : > { %v3343_v35 = vpack.c.bf16 %v1070_v28, %v1066_v42  ;;  %v1069_v47 = vmax.f32 %v3257_v50, 0.0 }
  0xdb   : > { %2591 = vmatmul.msk.bf16.gmra.mxu0 %vm641_vm1, %v2747_v46  ;;  %2607 = vmatmul.msk.bf16.gmra.mxu1 %vm641_vm1, %v2747_v46 }
  0xdc   : > { %2639 = vmatmul.msk.bf16.gmra.mxu3 %vm641_vm1, %v2747_v46 }
  0xdd   : > { %2623 = vmatmul.msk.bf16.gmra.mxu2 %vm641_vm1, %v2747_v46 }
  0xdf   : > { %v3263_v51 = vpop.f32.mrf.mxu3 }
  0xe0   : > { %v720_v52 = vpop.f32.mrf.mxu0  ;;  %v809_v53 = vpop.f32.mrf.mxu1 }
  0xe1   : > { %v1075_v56 = vmax.f32 %v720_v52, 0.0  ;;  %v1076_v57 = vmax.f32 %v809_v53, 0.0  ;;  %v3265_v58 = vpop.f32.mrf.mxu2 }
  0xe3   : > { %v3267_v59 = vpack.c.bf16 %v1075_v56, %v1071_v54  ;;  %v3269_v60 = vpack.c.bf16 %v1076_v57, %v1072_v55  ;;  %v3353_v57 = vpack.c.bf16 %v1069_v47, %v1065_v36 }
  0xe7   : > { %v3271_v62 = vpop.f32.mrf.mxu3 }
  0xe8   : > { %v723_v63 = vpop.f32.mrf.mxu0  ;;  %v812_v0 = vpop.f32.mrf.mxu1 }
  0xe9   : > { %v3273_v1 = vpop.f32.mrf.mxu2  ;;  %v1079_v5 = vmax.f32 %v723_v63, 0.0  ;;  %v1080_v6 = vmax.f32 %v812_v0, 0.0  ;;  %v1074_v63 = vmax.f32 %v3263_v51, 0.0  ;;  %v1073_v51 = vmax.f32 %v3265_v58, 0.0 }
  0xea   : > { %v1077_v31 = vmax.f32 %v3273_v1, 0.0 }
  0xeb   : > { %2592 = vmatmul.msk.bf16.gmra.mxu0 %vm641_vm1, %v2748_v61  ;;  %2608 = vmatmul.msk.bf16.gmra.mxu1 %vm641_vm1, %v2748_v61 }
  0xec   : > { %2640 = vmatmul.msk.bf16.gmra.mxu3 %vm641_vm1, %v2748_v61  ;;  %v3373_v36 = vpack.c.bf16 %v1077_v31, %v1073_v51 }
  0xed   : > { %2624 = vmatmul.msk.bf16.gmra.mxu2 %vm641_vm1, %v2748_v61  ;;  %v2752_v61 = vld [vmem:[#allocation3 + $0x78] sm:$0xff] }
  0xef   : > { %v3279_v2 = vpop.f32.mrf.mxu3 }
  0xf0   : > { %v725_v3 = vpop.f32.mrf.mxu0  ;;  %v814_v4 = vpop.f32.mrf.mxu1  ;;  %v1082_v1 = vmax.f32 %v3279_v2, 0.0 }
  0xf1   : > { %v1083_v7 = vmax.f32 %v725_v3, 0.0  ;;  %v1084_v8 = vmax.f32 %v814_v4, 0.0  ;;  %v3281_v9 = vpop.f32.mrf.mxu2 }
  0xf3   : > { %v3283_v10 = vpack.c.bf16 %v1083_v7, %v1079_v5  ;;  %v3285_v11 = vpack.c.bf16 %v1084_v8, %v1080_v6  ;;  %v1078_v5 = vmax.f32 %v3271_v62, 0.0 }
  0xf5   : > { %v3363_v50 = vpack.c.bf16 %v1078_v5, %v1074_v63 }
  0xf7   : > { %v3287_v13 = vpop.f32.mrf.mxu3 }
  0xf8   : > { %v3289_v14 = vpop.f32.mrf.mxu0  ;;  %v3291_v15 = vpop.f32.mrf.mxu1 }
  0xf9   : > { %v3293_v16 = vpop.f32.mrf.mxu2 }
  0xfb   : > { %2593 = vmatmul.msk.bf16.gmra.mxu0 %vm641_vm1, %v2749_v12  ;;  %2609 = vmatmul.msk.bf16.gmra.mxu1 %vm641_vm1, %v2749_v12 }
  0xfc   : > { %2641 = vmatmul.msk.bf16.gmra.mxu3 %vm641_vm1, %v2749_v12 }
  0xfd   : > { %2625 = vmatmul.msk.bf16.gmra.mxu2 %vm641_vm1, %v2749_v12 }
  0xff   : > { %v3299_v17 = vpop.f32.mrf.mxu3 }
 0x100   : > { %v3301_v18 = vpop.f32.mrf.mxu0  ;;  %v3303_v19 = vpop.f32.mrf.mxu1 }
 0x101   : > { %v3305_v20 = vpop.f32.mrf.mxu2  ;;  %v1092_v51 = vmax.f32 %v3303_v19, 0.0 }
 0x107   : > { %v3307_v23 = vpop.f32.mrf.mxu3 }
 0x108   : > { %v3309_v24 = vpop.f32.mrf.mxu0  ;;  %v3311_v25 = vpop.f32.mrf.mxu1 }
 0x109   : > { %v3314_v27 = vpop.f32.mrf.mxu2 }
 0x10b   : > { %2594 = vmatmul.msk.bf16.gmra.mxu0 %vm641_vm1, %v2750_v22  ;;  %2610 = vmatmul.msk.bf16.gmra.mxu1 %vm641_vm1, %v2750_v22 }
 0x10c   : > { %2642 = vmatmul.msk.bf16.gmra.mxu3 %vm641_vm1, %v2750_v22 }
 0x10d   : > { %2626 = vmatmul.msk.bf16.gmra.mxu2 %vm641_vm1, %v2750_v22 }
 0x10f   : > { %v3324_v37 = vpop.f32.mrf.mxu3 }
 0x110   : > { %v3326_v38 = vpop.f32.mrf.mxu0  ;;  %v3328_v21 = vpop.f32.mrf.mxu1 }
 0x111   : > { %v3331_v40 = vpop.f32.mrf.mxu2  ;;  %v1100_v63 = vmax.f32 %v3328_v21, 0.0  ;;  %v1091_v21 = vmax.f32 %v3301_v18, 0.0 }
 0x117   : > { %v3336_v46 = vpop.f32.mrf.mxu3 }
 0x118   : > { %v738_v48 = vpop.f32.mrf.mxu0  ;;  %v827_v49 = vpop.f32.mrf.mxu1 }
 0x119   : > { %v3339_v52 = vpop.f32.mrf.mxu2  ;;  %v1103_v47 = vmax.f32 %v738_v48, 0.0  ;;  %v1104_v58 = vmax.f32 %v827_v49, 0.0  ;;  %v1096_v48 = vmax.f32 %v3311_v25, 0.0  ;;  %v1086_v49 = vmax.f32 %v3287_v13, 0.0 }
 0x11a   : > { %v1085_v25 = vmax.f32 %v3293_v16, 0.0 }
 0x11b   : > { %2595 = vmatmul.msk.bf16.gmra.mxu0 %vm641_vm1, %v2751_v32  ;;  %2611 = vmatmul.msk.bf16.gmra.mxu1 %vm641_vm1, %v2751_v32  ;;  %v1204_v2 = vpack.c.bf16 %v1100_v63, %v1096_v48 }
 0x11c   : > { %2643 = vmatmul.msk.bf16.gmra.mxu3 %vm641_vm1, %v2751_v32 }
 0x11d   : > { %2627 = vmatmul.msk.bf16.gmra.mxu2 %vm641_vm1, %v2751_v32 }
 0x11f   : > { %v3348_v53 = vpop.f32.mrf.mxu3 }
 0x120   : > { %v740_v54 = vpop.f32.mrf.mxu0  ;;  %v829_v55 = vpop.f32.mrf.mxu1 }
 0x121   : > { %v3351_v56 = vpop.f32.mrf.mxu2  ;;  %v1107_v39 = vmax.f32 %v740_v54, 0.0  ;;  %v1108_v32 = vmax.f32 %v829_v55, 0.0  ;;  %v1095_v55 = vmax.f32 %v3309_v24, 0.0  ;;  %v1088_v24 = vmax.f32 %v3291_v15, 0.0 }
 0x127   : > { %v3356_v0 = vpop.f32.mrf.mxu3 }
 0x128   : > { %v743_v3 = vpop.f32.mrf.mxu0  ;;  %v832_v4 = vpop.f32.mrf.mxu1 }
 0x129   : > { %v3359_v43 = vpop.f32.mrf.mxu2  ;;  %v1111_v7 = vmax.f32 %v743_v3, 0.0  ;;  %v1112_v62 = vmax.f32 %v832_v4, 0.0  ;;  %v1207_v3 = vpack.c.bf16 %v1107_v39, %v1103_v47  ;;  %v1208_v4 = vpack.c.bf16 %v1108_v32, %v1104_v58 }
 0x12a   : > { %v1105_v58 = vmax.f32 %v3351_v56, 0.0  ;;  %v1101_v56 = vmax.f32 %v3339_v52, 0.0 }
 0x12b   : > { %2596 = vmatmul.msk.bf16.gmra.mxu0 %vm641_vm1, %v2752_v61  ;;  %2612 = vmatmul.msk.bf16.gmra.mxu1 %vm641_vm1, %v2752_v61 }
 0x12c   : > { %2644 = vmatmul.msk.bf16.gmra.mxu3 %vm641_vm1, %v2752_v61 }
 0x12d   : > { %2628 = vmatmul.msk.bf16.gmra.mxu2 %vm641_vm1, %v2752_v61  ;;  %v1099_v61 = vmax.f32 %v3326_v38, 0.0 }
 0x12f   : > { %v3368_v6 = vpop.f32.mrf.mxu3 }
 0x130   : > { %v745_v8 = vpop.f32.mrf.mxu0  ;;  %v834_v12 = vpop.f32.mrf.mxu1 }
 0x131   : > { %v1115_v22 = vmax.f32 %v745_v8, 0.0  ;;  %v1116_v26 = vmax.f32 %v834_v12, 0.0  ;;  %v3371_v34 = vpop.f32.mrf.mxu2  ;;  %v3387_v12 = vpack.c.bf16 %v1086_v49, %v1082_v1 }
 0x133   : > { %v1211_v42 = vpack.c.bf16 %v1115_v22, %v1111_v7  ;;  %v1212_v28 = vpack.c.bf16 %v1116_v26, %v1112_v62  ;;  %v1203_v7 = vpack.c.bf16 %v1099_v61, %v1095_v55  ;;  %v1081_v62 = vmax.f32 %v3281_v9, 0.0 }
 0x134   : > { %v1087_v22 = vmax.f32 %v3289_v14, 0.0  ;;  %v1200_v26 = vpack.c.bf16 %v1092_v51, %v1088_v24 }
 0x135   : > { %1439 = vmatpush.bf16.msrb.mxu0 %v1211_v42  ;;  %1537 = vmatpush.bf16.msrb.mxu2 %v1212_v28  ;;  %v1197_v39 = vpack.c.bf16 %v1085_v25, %v1081_v62  ;;  %v1114_v42 = vmax.f32 %v3368_v6, 0.0  ;;  %v1113_v28 = vmax.f32 %v3371_v34, 0.0 }
 0x136   : > { %v1199_v13 = vpack.c.bf16 %v1091_v21, %v1087_v22 }
 0x137   : > { %v1012_v5 = vpop.f32.mrf.mxu3 }
 0x138   : > { %v3378_v8 = vpop.f32.mrf.mxu0  ;;  %v3380_v54 = vpop.f32.mrf.mxu1  ;;  %v1118_v47 = vmax.f32 %v1012_v5, 0.0 }
 0x139   : > { %1440 = vmatpush.bf16.msrb.mxu0 %v1207_v3  ;;  %1538 = vmatpush.bf16.msrb.mxu2 %v1208_v4  ;;  %v923_v38 = vpop.f32.mrf.mxu2 }
 0x13a   : > { %v1214_v61 = vpack.c.bf16 %v1118_v47, %v1114_v42 }
 0x13d   : > { %1441 = vmatpush.bf16.msrb.mxu0 %v1203_v7  ;;  %1539 = vmatpush.bf16.msrb.mxu2 %v1204_v2 }
 0x13f   : > { %v3393_v31 = vpop.f32.mrf.mxu3 }
 0x140   : > { %4088 = vst [vmem:[#allocation19_spill] sm:$0xff] %v3393_v31  ;;  %v3395_v18 = vpop.f32.mrf.mxu0  ;;  %v3397_v19 = vpop.f32.mrf.mxu1 }
 0x141   : > { %1442 = vmatpush.bf16.msrb.mxu0 %v1199_v13  ;;  %1540 = vmatpush.bf16.msrb.mxu2 %v1200_v26  ;;  %v3399_v9 = vpop.f32.mrf.mxu2 }
 0x142   : > { %4089 = vst [vmem:[#allocation20_spill] sm:$0xff] %v3399_v9 }
 0x145   : > { %1443 = vmatpush.bf16.msrb.mxu0 %v3283_v10  ;;  %1541 = vmatpush.bf16.msrb.mxu2 %v3285_v11  ;;  %v1117_v10 = vmax.f32 %v923_v38, 0.0  ;;  %v1106_v11 = vmax.f32 %v3348_v53, 0.0  ;;  %v1102_v53 = vmax.f32 %v3336_v46, 0.0 }
 0x147   : > { %v3403_v14 = vpop.f32.mrf.mxu3  ;;  %v1213_v63 = vpack.c.bf16 %v1117_v10, %v1113_v28 }
 0x148   : > { %4090 = vst [vmem:[#allocation21_spill] sm:$0xff] %v3403_v14  ;;  %v3405_v15 = vpop.f32.mrf.mxu0  ;;  %v3407_v16 = vpop.f32.mrf.mxu1 }
 0x149   : > { %1444 = vmatpush.bf16.msrb.mxu0 %v3267_v59  ;;  %1542 = vmatpush.bf16.msrb.mxu2 %v3269_v60  ;;  %v3411_v32 = vpop.f32.mrf.mxu2  ;;  %v1110_v59 = vmax.f32 %v3356_v0, 0.0  ;;  %v1109_v60 = vmax.f32 %v3359_v43, 0.0 }
 0x14a   : > { %4091 = vst [vmem:[#allocation22_spill] sm:$0xff] %v3411_v32 }
 0x14b   : > { %v1210_v43 = vpack.c.bf16 %v1110_v59, %v1106_v11  ;;  %v1209_v4 = vpack.c.bf16 %v1109_v60, %v1105_v58 }
 0x14d   : > { %1445 = vmatpush.bf16.msrb.mxu0 %v3251_v44  ;;  %1543 = vmatpush.bf16.msrb.mxu2 %v3253_v45  ;;  %v1098_v44 = vmax.f32 %v3324_v37, 0.0  ;;  %v1097_v45 = vmax.f32 %v3331_v40, 0.0  ;;  %v1094_v37 = vmax.f32 %v3307_v23, 0.0  ;;  %v1093_v40 = vmax.f32 %v3314_v27, 0.0 }
 0x14f   : > { %v3421_v3 = vpop.f32.mrf.mxu3  ;;  %v1206_v1 = vpack.c.bf16 %v1102_v53, %v1098_v44  ;;  %v1205_v5 = vpack.c.bf16 %v1101_v56, %v1097_v45 }
 0x150   : > { %4092 = vst [vmem:[#allocation23_spill] sm:$0xff] %v3421_v3  ;;  %v3423_v6 = vpop.f32.mrf.mxu0  ;;  %v3425_v34 = vpop.f32.mrf.mxu1  ;;  %v1275_v3 = vld [vmem:[#allocation8 + $0x60] sm:$0xff] }
 0x151   : > { %1446 = vmatpush.bf16.msrb.mxu0 %v3235_v29  ;;  %1544 = vmatpush.bf16.msrb.mxu2 %v3237_v30  ;;  %v3433_v0 = vpop.f32.mrf.mxu2  ;;  %v1090_v29 = vmax.f32 %v3299_v17, 0.0  ;;  %v1089_v30 = vmax.f32 %v3305_v20, 0.0 }
 0x152   : > { %4093 = vst [vmem:[#allocation24_spill] sm:$0xff] %v3433_v0 }
 0x153   : > { %v1202_v49 = vpack.c.bf16 %v1094_v37, %v1090_v29  ;;  %v1201_v38 = vpack.c.bf16 %v1093_v40, %v1089_v30 }
 0x155   : > { %1733 = vmatpush.bf16.msra.mxu2 %v1214_v61  ;;  %1635 = vmatpush.bf16.msra.mxu0 %v1213_v63  ;;  %v3018_v61 = vmov 0   ;;  %v1277_v63 = vld [vmem:[#allocation8 + $0x70] sm:$0xff] }
 0x156   : > { %2846 = vset.pattern.permute.xlu0 %v3018_v61  ;;  %2847 = vset.pattern.permute.xlu1 %v3018_v61 }
 0x157   : > { %v3439_v46 = vpop.f32.mrf.mxu3  ;;  %1351 = vperm.xlu0 %2846, %v1277_v63   ;;  %2848 = vset.pattern.permute.xlu2 %v3018_v61 }
 0x158   : > { %4094 = vst [vmem:[#allocation25_spill] sm:$0xff] %v3439_v46  ;;  %v3441_v52 = vpop.f32.mrf.mxu0  ;;  %v3443_v55 = vpop.f32.mrf.mxu1  ;;  %1341 = vperm.xlu1 %2847, %v1275_v3  }
 0x159   : > { %1734 = vmatpush.bf16.msra.mxu2 %v1210_v43  ;;  %1636 = vmatpush.bf16.msra.mxu0 %v1209_v4  ;;  %v3445_v48 = vpop.f32.mrf.mxu2  ;;  %v2647_v43 = vld [vmem:[#allocation6] sm:$0xf]  ;;  %v2754_v4 = vld [vmem:[#allocation6 + $0x4] sm:$0xf0] }
 0x15a   : > { %4095 = vst [vmem:[#allocation26_spill] sm:$0xff] %v3445_v48  ;;  %v2655_v48 = vld [vmem:[#allocation6 + $0x10] sm:$0xf] }
 0x15d   : > { %1735 = vmatpush.bf16.msra.mxu2 %v1206_v1  ;;  %1637 = vmatpush.bf16.msra.mxu0 %v1205_v5  ;;  %v1278_v1 = vld [vmem:[#allocation8 + $0x78] sm:$0xff]  ;;  %v3514_v5 = vor.u32 %v2754_v4, %v2647_v43 }
 0x15f   : > { %v3447_v17 = vpop.f32.mrf.mxu3  ;;  %4098 = vst [vmem:[#allocation29_spill] sm:$0xff] %v3514_v5  ;;  %1356 = vperm.xlu0 %2846, %v1278_v1   ;;  %1447 = vmatmul.bf16.vlgmr.msrb.gmra.mxu0 %v3514_v5 }
 0x160   : > { %v3449_v20 = vpop.f32.mrf.mxu0  ;;  %v3451_v23 = vpop.f32.mrf.mxu1  ;;  %1545 = vmatmul.bf16.vlgmr.msrb.gmra.mxu2 %v3514_v5  ;;  %v2756_v5 = vld [vmem:[#allocation6 + $0x14] sm:$0xf0] }
 0x161   : > { %1736 = vmatpush.bf16.msra.mxu2 %v1202_v49  ;;  %1638 = vmatpush.bf16.msra.mxu0 %v1201_v38  ;;  %v3453_v27 = vpop.f32.mrf.mxu2  ;;  %v1271_v49 = vld [vmem:[#allocation8 + $0x40] sm:$0xff] }
 0x165   : > { %1737 = vmatpush.bf16.msra.mxu2 %v3387_v12  ;;  %1639 = vmatpush.bf16.msra.mxu0 %v1197_v39 }
 0x167   : > { %v3458_v21 = vpop.f32.mrf.mxu3  ;;  %1321 = vperm.xlu0 %2846, %v1271_v49   ;;  %v1270_v49 = vld [vmem:[#allocation8 + $0x38] sm:$0xff] }
 0x168   : > { %4096 = vst [vmem:[#allocation27_spill] sm:$0xff] %v3458_v21  ;;  %v3460_v51 = vpop.f32.mrf.mxu0  ;;  %v3462_v7 = vpop.f32.mrf.mxu1 }
 0x169   : > { %1738 = vmatpush.bf16.msra.mxu2 %v3363_v50  ;;  %1640 = vmatpush.bf16.msra.mxu0 %v3373_v36  ;;  %v3464_v2 = vpop.f32.mrf.mxu2 }
 0x16a   : > { %4097 = vst [vmem:[#allocation28_spill] sm:$0xff] %v3464_v2  ;;  %v3526_v2 = vor.u32 %v2756_v5, %v2655_v48  ;;  %v1276_v5 = vld [vmem:[#allocation8 + $0x68] sm:$0xff] }
 0x16b   : > { %1346 = vperm.xlu1 %2847, %v1276_v5  }
 0x16d   : > { %1739 = vmatpush.bf16.msra.mxu2 %v3343_v35  ;;  %1641 = vmatpush.bf16.msra.mxu0 %v3353_v57 }
 0x16f   : > { %v3470_v12 = vpop.f32.mrf.mxu3  ;;  %1452 = vmatmul.bf16.gmra.mxu0 %v3526_v2  ;;  %1316 = vperm.xlu0 %2846, %v1270_v49   ;;  %v2663_v49 = vld [vmem:[#allocation6 + $0x20] sm:$0xf] }
 0x170   : > { %v3472_v50 = vpop.f32.mrf.mxu0  ;;  %v3474_v36 = vpop.f32.mrf.mxu1  ;;  %1550 = vmatmul.bf16.gmra.mxu2 %v3526_v2 }
 0x171   : > { %1740 = vmatpush.bf16.msra.mxu2 %v3320_v33  ;;  %1642 = vmatpush.bf16.msra.mxu0 %v3333_v41  ;;  %v3476_v62 = vpop.f32.mrf.mxu2 }
 0x177   : > { %v3478_v22 = vpop.f32.mrf.mxu3 }
 0x178   : > { %v3480_v24 = vpop.f32.mrf.mxu0  ;;  %v3482_v25 = vpop.f32.mrf.mxu1 }
 0x179   : > { %v3484_v35 = vpop.f32.mrf.mxu2 }
 0x17f   : > { %v3490_v41 = vpop.f32.mrf.mxu3 }
 0x180   : > { %v3486_v57 = vpop.f32.mrf.mxu0  ;;  %v3488_v33 = vpop.f32.mrf.mxu1 }
 0x181   : > { %v3492_v13 = vpop.f32.mrf.mxu2 }
 0x187   : > { %v3498_v42 = vpop.f32.mrf.mxu3 }
 0x188   : > { %v3494_v26 = vpop.f32.mrf.mxu0  ;;  %v3496_v39 = vpop.f32.mrf.mxu1 }
 0x189   : > { %v3500_v28 = vpop.f32.mrf.mxu2  ;;  %v1159_v48 = vmax.f32 %v3494_v26, 0.0  ;;  %v1160_v3 = vmax.f32 %v3496_v39, 0.0 }
 0x18f   : > { %v3506_v11 = vpop.f32.mrf.mxu3 }
 0x190   : > { %v3502_v47 = vpop.f32.mrf.mxu0  ;;  %v3504_v10 = vpop.f32.mrf.mxu1 }
 0x191   : > { %v3508_v58 = vpop.f32.mrf.mxu2 }
 0x197   : > { %v3510_v44 = vpop.f32.mrf.mxu3 }
 0x198   : > { %v778_v59 = vpop.f32.mrf.mxu0  ;;  %v867_v60 = vpop.f32.mrf.mxu1 }
 0x199   : > { %v3512_v45 = vpop.f32.mrf.mxu2  ;;  %v1167_v21 = vmax.f32 %v778_v59, 0.0 }
 0x19f   : > { %v3518_v37 = vpop.f32.mrf.mxu3 }
 0x1a0   : > { %v780_v53 = vpop.f32.mrf.mxu0  ;;  %v869_v56 = vpop.f32.mrf.mxu1 }
 0x1a1   : > { %v3520_v40 = vpop.f32.mrf.mxu2  ;;  %v1171_v4 = vmax.f32 %v780_v53, 0.0  ;;  %v1172_v1 = vmax.f32 %v869_v56, 0.0 }
 0x1a3   : > { %v1239_v53 = vpack.c.bf16 %v1171_v4, %v1167_v21  ;;  %v1151_v21 = vmax.f32 %v3480_v24, 0.0  ;;  %v1139_v24 = vmax.f32 %v3449_v20, 0.0  ;;  %v1131_v20 = vmax.f32 %v3423_v6, 0.0 }
 0x1a7   : > { %v3522_v46 = vpop.f32.mrf.mxu3 }
 0x1a8   : > { %v783_v29 = vpop.f32.mrf.mxu0  ;;  %v872_v30 = vpop.f32.mrf.mxu1 }
 0x1a9   : > { %v1175_v63 = vmax.f32 %v783_v29, 0.0  ;;  %v1176_v32 = vmax.f32 %v872_v30, 0.0  ;;  %v3524_v0 = vpop.f32.mrf.mxu2  ;;  %v1168_v29 = vmax.f32 %v867_v60, 0.0  ;;  %v1273_v30 = vld [vmem:[#allocation8 + $0x50] sm:$0xff] }
 0x1aa   : > { %1331 = vperm.xlu2 %2848, %v1273_v30  }
 0x1ab   : > { %v1240_v56 = vpack.c.bf16 %v1172_v1, %v1168_v29  ;;  %v2758_v29 = vld [vmem:[#allocation6 + $0x24] sm:$0xf0] }
 0x1af   : > { %v1050_v26 = vpop.f32.mrf.mxu3 }
 0x1b0   : > { %v785_v38 = vpop.f32.mrf.mxu0  ;;  %v874_v61 = vpop.f32.mrf.mxu1 }
 0x1b1   : > { %v1179_v14 = vmax.f32 %v785_v38, 0.0  ;;  %v1180_v43 = vmax.f32 %v874_v61, 0.0  ;;  %v961_v39 = vpop.f32.mrf.mxu2  ;;  %v1147_v38 = vmax.f32 %v3472_v50, 0.0  ;;  %v1272_v50 = vld [vmem:[#allocation8 + $0x48] sm:$0xff] }
 0x1b2   : > { %1326 = vperm.xlu1 %2847, %v1272_v50   ;;  %v1177_v6 = vmax.f32 %v961_v39, 0.0  ;;  %v1170_v39 = vmax.f32 %v3518_v37, 0.0  ;;  %v1165_v37 = vmax.f32 %v3512_v45, 0.0  ;;  %v1153_v45 = vmax.f32 %v3492_v13, 0.0  ;;  %v2755_v13 = vld [vmem:[#allocation6 + $0x14] sm:$0xf] }
 0x1b3   : > { %v1243_v9 = vpack.c.bf16 %v1179_v14, %v1175_v63  ;;  %v1244_v31 = vpack.c.bf16 %v1180_v43, %v1176_v32  ;;  %v1163_v14 = vmax.f32 %v3502_v47, 0.0  ;;  %v1164_v32 = vmax.f32 %v3504_v10, 0.0  ;;  %v1265_v47 = vld [vmem:[#allocation8 + $0x10] sm:$0xff] }
 0x1b4   : > { %v1152_v10 = vmax.f32 %v3482_v25, 0.0  ;;  %1291 = vperm.xlu0 %2846, %v1265_v47   ;;  %v1143_v63 = vmax.f32 %v3460_v51, 0.0  ;;  %v1144_v43 = vmax.f32 %v3462_v7, 0.0  ;;  %v1140_v25 = vmax.f32 %v3451_v23, 0.0  ;;  %v1264_v7 = vld [vmem:[#allocation8 + $0x8] sm:$0xff]  ;;  %v1267_v47 = vld [vmem:[#allocation8 + $0x20] sm:$0xff] }
 0x1b5   : > { %1488 = vmatpush.bf16.msrb.mxu1 %v1243_v9  ;;  %1586 = vmatpush.bf16.msrb.mxu3 %v1244_v31  ;;  %v1155_v9 = vmax.f32 %v3486_v57, 0.0  ;;  %v1156_v31 = vmax.f32 %v3488_v33, 0.0  ;;  %v1235_v59 = vpack.c.bf16 %v1163_v14, %v1159_v48  ;;  %v1236_v60 = vpack.c.bf16 %v1164_v32, %v1160_v3 }
 0x1b6   : > { %v1148_v57 = vmax.f32 %v3474_v36, 0.0  ;;  %v1227_v4 = vpack.c.bf16 %v1147_v38, %v1143_v63  ;;  %v3544_v14 = vor.u32 %v2758_v29, %v2663_v49  ;;  %v1274_v36 = vld [vmem:[#allocation8 + $0x58] sm:$0xff]  ;;  %v1135_v32 = vmax.f32 %v3441_v52, 0.0 }
 0x1b7   : > { %v1231_v33 = vpack.c.bf16 %v1155_v9, %v1151_v21  ;;  %v1232_v61 = vpack.c.bf16 %v1156_v31, %v1152_v10  ;;  %v1136_v51 = vmax.f32 %v3443_v55, 0.0  ;;  %v1132_v23 = vmax.f32 %v3425_v34, 0.0  ;;  %v1052_v48 = vpop.f32.mrf.mxu3  ;;  %1336 = vperm.xlu2 %2848, %v1274_v36  }
 0x1b8   : > { %v1228_v1 = vpack.c.bf16 %v1148_v57, %v1144_v43  ;;  %1457 = vmatmul.bf16.gmra.mxu0 %v3544_v14  ;;  %1555 = vmatmul.bf16.gmra.mxu2 %v3544_v14  ;;  %v1123_v52 = vmax.f32 %v3395_v18, 0.0  ;;  %v1124_v55 = vmax.f32 %v3397_v19, 0.0  ;;  %v1127_v9 = vmax.f32 %v3405_v15, 0.0  ;;  %v1269_v18 = vld [vmem:[#allocation8 + $0x30] sm:$0xff]  ;;  %v2753_v19 = vld [vmem:[#allocation6 + $0x4] sm:$0xf] }
 0x1b9   : > { %1489 = vmatpush.bf16.msrb.mxu1 %v1239_v53  ;;  %1587 = vmatpush.bf16.msrb.mxu3 %v1240_v56  ;;  %v1223_v53 = vpack.c.bf16 %v1139_v24, %v1135_v32  ;;  %v1224_v56 = vpack.c.bf16 %v1140_v25, %v1136_v51  ;;  %v963_v3 = vpop.f32.mrf.mxu2  ;;  %v1128_v31 = vmax.f32 %v3407_v16, 0.0  ;;  %v1119_v21 = vmax.f32 %v3378_v8, 0.0  ;;  %v2649_v15 = vld [vmem:[#allocation6 + $0x8] sm:$0xf0]  ;;  %v2760_v25 = vld [vmem:[#allocation6 + $0x34] sm:$0xf0] }
 0x1ba   : > { %v1181_v34 = vmax.f32 %v963_v3, 0.0  ;;  %v1219_v5 = vpack.c.bf16 %v1131_v20, %v1127_v9  ;;  %v1120_v10 = vmax.f32 %v3380_v54, 0.0  ;;  %1301 = vperm.xlu1 %2847, %v1267_v47   ;;  %v1173_v8 = vmax.f32 %v3524_v0, 0.0  ;;  %v1266_v0 = vld [vmem:[#allocation8 + $0x18] sm:$0xff]  ;;  %v4101_v9 = vld [vmem:[#allocation23_spill] sm:$0xff] }
 0x1bb   : > { %v1220_v30 = vpack.c.bf16 %v1132_v23, %v1128_v31  ;;  %v1215_v16 = vpack.c.bf16 %v1123_v52, %v1119_v21  ;;  %v3562_v54 = vor.u32 %v2753_v19, %v2649_v15  ;;  %v1162_v63 = vmax.f32 %v3506_v11, 0.0  ;;  %v1268_v11 = vld [vmem:[#allocation8 + $0x28] sm:$0xff]  ;;  %v1263_v23 = vld [vmem:[#allocation8] sm:$0xff]  ;;  %v4107_v15 = vld [vmem:[#allocation21_spill] sm:$0xff] }
 0x1bc   : > { %1286 = vperm.xlu0 %2846, %v1264_v7   ;;  %v1216_v38 = vpack.c.bf16 %v1124_v55, %v1120_v10  ;;  %v1161_v43 = vmax.f32 %v3508_v58, 0.0  ;;  %v1166_v24 = vmax.f32 %v3510_v44, 0.0  ;;  %v1154_v58 = vmax.f32 %v3490_v41, 0.0  ;;  %v2679_v52 = vld [vmem:[#allocation6 + $0x40] sm:$0xf]  ;;  %v4105_v21 = vld [vmem:[#allocation19_spill] sm:$0xff] }
 0x1bd   : > { %1490 = vmatpush.bf16.msrb.mxu1 %v1235_v59  ;;  %1588 = vmatpush.bf16.msrb.mxu3 %v1236_v60  ;;  %v1178_v59 = vmax.f32 %v1050_v26, 0.0  ;;  %v1182_v60 = vmax.f32 %v1052_v48, 0.0  ;;  %v1245_v26 = vpack.c.bf16 %v1181_v34, %v1177_v6  ;;  %v1158_v49 = vmax.f32 %v3498_v42, 0.0  ;;  %v2657_v42 = vld [vmem:[#allocation6 + $0x18] sm:$0xf0]  ;;  %v4100_v48 = vld [vmem:[#allocation28_spill] sm:$0xff] }
 0x1be   : > { %v1238_v44 = vpack.c.bf16 %v1166_v24, %v1162_v63  ;;  %v1157_v29 = vmax.f32 %v3500_v28, 0.0  ;;  %v1237_v50 = vpack.c.bf16 %v1165_v37, %v1161_v43  ;;  %v1146_v36 = vmax.f32 %v3470_v12, 0.0  ;;  %v2762_v55 = vld [vmem:[#allocation6 + $0x44] sm:$0xf0]  ;;  %v4104_v34 = vld [vmem:[#allocation26_spill] sm:$0xff] }
 0x1bf   : > { %v1246_v57 = vpack.c.bf16 %v1182_v60, %v1178_v59  ;;  %1311 = vperm.xlu2 %2848, %v1269_v18   ;;  %v1145_v32 = vmax.f32 %v3476_v62, 0.0  ;;  %v1150_v41 = vmax.f32 %v3478_v22, 0.0  ;;  %v1149_v51 = vmax.f32 %v3484_v35, 0.0  ;;  %v4099_v22 = vld [vmem:[#allocation27_spill] sm:$0xff]  ;;  %v4102_v59 = vld [vmem:[#allocation24_spill] sm:$0xff] }
 0x1c0   : > { %v1234_v7 = vpack.c.bf16 %v1158_v49, %v1154_v58  ;;  %v1233_v20 = vpack.c.bf16 %v1157_v29, %v1153_v45  ;;  %v1138_v12 = vmax.f32 %v3447_v17, 0.0  ;;  %v1137_v62 = vmax.f32 %v3453_v27, 0.0  ;;  %v4103_v17 = vld [vmem:[#allocation25_spill] sm:$0xff]  ;;  %v4106_v18 = vld [vmem:[#allocation20_spill] sm:$0xff]  ;;  %v2665_v63 = vld [vmem:[#allocation6 + $0x28] sm:$0xf0] }
 0x1c1   : > { %1491 = vmatpush.bf16.msrb.mxu1 %v1231_v33  ;;  %1589 = vmatpush.bf16.msrb.mxu3 %v1232_v61  ;;  %v1169_v33 = vmax.f32 %v3520_v40, 0.0  ;;  %v1174_v61 = vmax.f32 %v3522_v46, 0.0  ;;  %v2671_v40 = vld [vmem:[#allocation6 + $0x30] sm:$0xf]  ;;  %v1230_v28 = vpack.c.bf16 %v1150_v41, %v1146_v36  ;;  %v1142_v35 = vmax.f32 %v4099_v22, 0.0 }
 0x1c2   : > { %1296 = vperm.xlu1 %2847, %v1266_v0   ;;  %v1141_v3 = vmax.f32 %v4100_v48, 0.0  ;;  %v1130_v31 = vmax.f32 %v4101_v9, 0.0  ;;  %v1129_v6 = vmax.f32 %v4102_v59, 0.0  ;;  %v3592_v60 = vor.u32 %v2762_v55, %v2679_v52  ;;  %v2687_v24 = vld [vmem:[#allocation6 + $0x50] sm:$0xf] }
 0x1c3   : > { %v1242_v46 = vpack.c.bf16 %v1174_v61, %v1170_v39  ;;  %v1134_v27 = vmax.f32 %v4103_v17, 0.0  ;;  %v1122_v10 = vmax.f32 %v4105_v21, 0.0  ;;  %v1121_v19 = vmax.f32 %v4106_v18, 0.0  ;;  %v2764_v37 = vld [vmem:[#allocation6 + $0x54] sm:$0xf0] }
 0x1c4   : > { %v1225_v47 = vpack.c.bf16 %v1141_v3, %v1137_v62  ;;  %v2695_v0 = vld [vmem:[#allocation6 + $0x60] sm:$0xf]  ;;  %v2681_v45 = vld [vmem:[#allocation6 + $0x48] sm:$0xf0]  ;;  %v2703_v29 = vld [vmem:[#allocation6 + $0x70] sm:$0xf] }
 0x1c5   : > { %1492 = vmatpush.bf16.msrb.mxu1 %v1227_v4  ;;  %1590 = vmatpush.bf16.msrb.mxu3 %v1228_v1  ;;  %v1241_v4 = vpack.c.bf16 %v1173_v8, %v1169_v33  ;;  %v3570_v1 = vor.u32 %v2760_v25, %v2671_v40  ;;  %v2757_v8 = vld [vmem:[#allocation6 + $0x24] sm:$0xf]  ;;  %v3606_v40 = vor.u32 %v2764_v37, %v2687_v24  ;;  %v2759_v25 = vld [vmem:[#allocation6 + $0x34] sm:$0xf]  ;;  %v2689_v41 = vld [vmem:[#allocation6 + $0x58] sm:$0xf0] }
 0x1c6   : > { %v3602_v43 = vor.u32 %v2757_v8, %v2665_v63  ;;  %v2705_v59 = vld [vmem:[#allocation6 + $0x78] sm:$0xf0] }
 0x1c7   : > { %1306 = vperm.xlu2 %2848, %v1268_v11   ;;  %v2766_v11 = vld [vmem:[#allocation6 + $0x64] sm:$0xf0] }
 0x1c8   : > { %1462 = vmatmul.bf16.gmra.mxu0 %v3570_v1  ;;  %1560 = vmatmul.bf16.gmra.mxu2 %v3570_v1  ;;  %v3614_v58 = vor.u32 %v2766_v11, %v2695_v0 }
 0x1c9   : > { %1493 = vmatpush.bf16.msrb.mxu1 %v1223_v53  ;;  %1591 = vmatpush.bf16.msrb.mxu3 %v1224_v56  ;;  %v1229_v53 = vpack.c.bf16 %v1149_v51, %v1145_v32  ;;  %v3582_v56 = vor.u32 %v2755_v13, %v2657_v42  ;;  %v2763_v32 = vld [vmem:[#allocation6 + $0x54] sm:$0xf]  ;;  %v4109_v13 = vld [vmem:[#allocation29_spill] sm:$0xff] }
 0x1ca   : > { %v3626_v51 = vor.u32 %v2763_v32, %v2689_v41 }
 0x1cd   : > { %1494 = vmatpush.bf16.msrb.mxu1 %v1219_v5  ;;  %1592 = vmatpush.bf16.msrb.mxu3 %v1220_v30  ;;  %v1133_v5 = vmax.f32 %v4104_v34, 0.0  ;;  %v1226_v30 = vpack.c.bf16 %v1142_v35, %v1138_v12 }
 0x1cf   : > { %1281 = vperm.xlu2 %2848, %v1263_v23   ;;  %v1221_v39 = vpack.c.bf16 %v1133_v5, %v1129_v6  ;;  %v3650_v6 = vpop.permute.xlu1 %1341 }
 0x1d1   : > { %1495 = vmatpush.bf16.msrb.mxu1 %v1215_v16  ;;  %1593 = vmatpush.bf16.msrb.mxu3 %v1216_v38  ;;  %v1126_v16 = vmax.f32 %v4107_v15, 0.0  ;;  %v4108_v38 = vld [vmem:[#allocation22_spill] sm:$0xff] }
 0x1d3   : > { %v1218_v33 = vpack.c.bf16 %v1126_v16, %v1122_v10 }
 0x1d4   : > { %1496 = vmatmul.bf16.vlgmr.msrb.gmra.mxu1 %v3562_v54  ;;  %1594 = vmatmul.bf16.vlgmr.msrb.gmra.mxu3 %v3562_v54 }
 0x1d5   : > { %1782 = vmatpush.bf16.msra.mxu3 %v1246_v57  ;;  %1684 = vmatpush.bf16.msra.mxu1 %v1245_v26  ;;  %v1125_v57 = vmax.f32 %v4108_v38, 0.0  ;;  %v1222_v26 = vpack.c.bf16 %v1134_v27, %v1130_v31  ;;  %v2767_v31 = vld [vmem:[#allocation6 + $0x74] sm:$0xf] }
 0x1d6   : > { %v3652_v17 = vor.u32 %v2767_v31, %v2705_v59 }
 0x1d7   : > { %v1217_v61 = vpack.c.bf16 %v1125_v57, %v1121_v19 }
 0x1d8   : > { %1467 = vmatmul.bf16.gmra.mxu0 %v3592_v60  ;;  %1565 = vmatmul.bf16.gmra.mxu2 %v3592_v60 }
 0x1d9   : > { %1783 = vmatpush.bf16.msra.mxu3 %v1242_v46  ;;  %1685 = vmatpush.bf16.msra.mxu1 %v1241_v4  ;;  %v2673_v46 = vld [vmem:[#allocation6 + $0x38] sm:$0xf0] }
 0x1da   : > { %v3610_v4 = vor.u32 %v2759_v25, %v2673_v46 }
 0x1dc   : > { %v1448_v42 = vpop.f32.mrf.mxu0 }
 0x1dd   : > { %1784 = vmatpush.bf16.msra.mxu3 %v1238_v44  ;;  %1686 = vmatpush.bf16.msra.mxu1 %v1237_v50  ;;  %v2761_v44 = vld [vmem:[#allocation6 + $0x44] sm:$0xf]  ;;  %v2768_v50 = vld [vmem:[#allocation6 + $0x74] sm:$0xf0] }
 0x1de   : > { %v3618_v49 = vor.u32 %v2761_v44, %v2681_v45  ;;  %v3622_v36 = vor.u32 %v2768_v50, %v2703_v29 }
 0x1e1   : > { %1785 = vmatpush.bf16.msra.mxu3 %v1234_v7  ;;  %1687 = vmatpush.bf16.msra.mxu1 %v1233_v20  ;;  %v3628_v7 = vpop.permute.xlu0 %1351 }
 0x1e3   : > { %v1546_v23 = vpop.f32.mrf.mxu2 }
 0x1e4   : > { %1501 = vmatmul.bf16.gmra.mxu1 %v3582_v56  ;;  %1599 = vmatmul.bf16.gmra.mxu3 %v3582_v56  ;;  %v1450_v35 = vpop.f32.mrf.mxu0 }
 0x1e5   : > { %1786 = vmatpush.bf16.msra.mxu3 %v1230_v28  ;;  %1688 = vmatpush.bf16.msra.mxu1 %v1229_v53  ;;  %v2765_v28 = vld [vmem:[#allocation6 + $0x64] sm:$0xf]  ;;  %v2697_v53 = vld [vmem:[#allocation6 + $0x68] sm:$0xf0] }
 0x1e6   : > { %v3640_v22 = vor.u32 %v2765_v28, %v2697_v53 }
 0x1e8   : > { %1472 = vmatmul.bf16.gmra.mxu0 %v3606_v40  ;;  %1570 = vmatmul.bf16.gmra.mxu2 %v3606_v40 }
 0x1e9   : > { %1787 = vmatpush.bf16.msra.mxu3 %v1226_v30  ;;  %1689 = vmatpush.bf16.msra.mxu1 %v1225_v47  ;;  %v3636_v12 = vpop.permute.xlu0 %1356 }
 0x1eb   : > { %v1548_v48 = vpop.f32.mrf.mxu2 }
 0x1ec   : > { %v1453_v55 = vpop.f32.mrf.mxu0 }
 0x1ed   : > { %1788 = vmatpush.bf16.msra.mxu3 %v1222_v26  ;;  %1690 = vmatpush.bf16.msra.mxu1 %v1221_v39 }
 0x1f1   : > { %1789 = vmatpush.bf16.msra.mxu3 %v1218_v33  ;;  %1691 = vmatpush.bf16.msra.mxu1 %v1217_v61  ;;  %v3646_v3 = vpop.permute.xlu0 %1321 }
 0x1f2   : > { %4110 = vst [vmem:[#allocation27_spill] sm:$0xff] %v3646_v3 }
 0x1f3   : > { %v1551_v9 = vpop.f32.mrf.mxu2 }
 0x1f4   : > { %1506 = vmatmul.bf16.gmra.mxu1 %v3602_v43  ;;  %1604 = vmatmul.bf16.gmra.mxu3 %v3602_v43  ;;  %v1455_v5 = vpop.f32.mrf.mxu0 }
 0x1f8   : > { %1477 = vmatmul.bf16.gmra.mxu0 %v3614_v58  ;;  %1575 = vmatmul.bf16.gmra.mxu2 %v3614_v58 }
 0x1f9   : > { %v3654_v27 = vpop.permute.xlu0 %1316 }
 0x1fa   : > { %4111 = vst [vmem:[#allocation28_spill] sm:$0xff] %v3654_v27 }
 0x1fb   : > { %v1553_v30 = vpop.f32.mrf.mxu2 }
 0x204   : > { %1511 = vmatmul.bf16.gmra.mxu1 %v3610_v4  ;;  %1609 = vmatmul.bf16.gmra.mxu3 %v3610_v4  ;;  %v3630_v20 = vpop.permute.xlu2 %1331 }
 0x208   : > { %1482 = vmatmul.bf16.gmra.mxu0 %v3622_v36  ;;  %1580 = vmatmul.bf16.gmra.mxu2 %v3622_v36 }
 0x211   : > { %v3638_v62 = vpop.permute.xlu2 %1336 }
 0x214   : > { %1516 = vmatmul.bf16.gmra.mxu1 %v3618_v49  ;;  %1614 = vmatmul.bf16.gmra.mxu3 %v3618_v49 }
 0x218   : > { %1643 = vmatmul.bf16.vlgmr.msra.gmra.mxu0 %v4109_v13  ;;  %1741 = vmatmul.bf16.vlgmr.msra.gmra.mxu2 %v4109_v13 }
 0x219   : > { %v3648_v52 = vpop.permute.xlu2 %1311 }
 0x221   : > { %v3656_v34 = vpop.permute.xlu2 %1306 }
 0x224   : > { %1521 = vmatmul.bf16.gmra.mxu1 %v3626_v51  ;;  %1619 = vmatmul.bf16.gmra.mxu3 %v3626_v51 }
 0x226   : > { %v3666_v10 = vpop.permute.xlu0 %1291 }
 0x227   : > { %v1454_v11 = vadd.f32 %v1453_v55, %v3666_v10  ;;  %v1552_v28 = vadd.f32 %v1551_v9, %v3666_v10 }
 0x228   : > { %1648 = vmatmul.bf16.gmra.mxu0 %v3526_v2  ;;  %1746 = vmatmul.bf16.gmra.mxu2 %v3526_v2  ;;  %v3662_v2 = vpop.permute.xlu1 %1346 }
 0x229   : > { %v3668_v18 = vpop.permute.xlu2 %1281 }
 0x22a   : > { %v1449_v19 = vadd.f32 %v1448_v42, %v3668_v18 }
 0x22e   : > { %v3680_v39 = vpop.permute.xlu0 %1286 }
 0x22f   : > { %4112 = vst [vmem:[#allocation23_spill] sm:$0xff] %v3680_v39  ;;  %v1451_v61 = vadd.f32 %v1450_v35, %v3680_v39  ;;  %v1549_v44 = vadd.f32 %v1548_v48, %v3680_v39 }
 0x230   : > { %v3671_v16 = vpop.permute.xlu1 %1326 }
 0x234   : > { %1526 = vmatmul.bf16.gmra.mxu1 %v3640_v22  ;;  %1624 = vmatmul.bf16.gmra.mxu3 %v3640_v22 }
 0x235   : > { %v1458_v47 = vpop.f32.mrf.mxu0 }
 0x238   : > { %1653 = vmatmul.bf16.gmra.mxu0 %v3544_v14  ;;  %1751 = vmatmul.bf16.gmra.mxu2 %v3544_v14  ;;  %v1547_v14 = vadd.f32 %v1546_v23, %v3668_v18  ;;  %v3687_v46 = vpop.permute.xlu1 %1301 }
 0x239   : > { %v1459_v9 = vadd.f32 %v1458_v47, %v3687_v46 }
 0x23b   : > { %v3664_v21 = vpop.f32.mrf.mxu2 }
 0x23c   : > { %v1557_v47 = vadd.f32 %v3664_v21, %v3687_v46 }
 0x23d   : > { %v3673_v38 = vpop.f32.mrf.mxu0 }
 0x240   : > { %v3702_v35 = vpop.permute.xlu1 %1296 }
 0x241   : > { %4113 = vst [vmem:[#allocation24_spill] sm:$0xff] %v3702_v35  ;;  %v1456_v55 = vadd.f32 %v1455_v5, %v3702_v35 }
 0x243   : > { %v3675_v57 = vpop.f32.mrf.mxu2 }
 0x244   : > { %1531 = vmatmul.bf16.gmra.mxu1 %v3652_v17  ;;  %1629 = vmatmul.bf16.gmra.mxu3 %v3652_v17 }
 0x245   : > { %v1463_v24 = vpop.f32.mrf.mxu0 }
 0x246   : > { %v1464_v21 = vadd.f32 %v1463_v24, %v3648_v52 }
 0x248   : > { %1658 = vmatmul.bf16.gmra.mxu0 %v3570_v1  ;;  %1756 = vmatmul.bf16.gmra.mxu2 %v3570_v1 }
 0x24b   : > { %v3685_v37 = vpop.f32.mrf.mxu2 }
 0x24c   : > { %v1562_v24 = vadd.f32 %v3685_v37, %v3648_v52 }
 0x24d   : > { %v3693_v32 = vpop.f32.mrf.mxu0 }
 0x251   : > { %v1497_v15 = vpop.f32.mrf.mxu1 }
 0x252   : > { %v1498_v26 = vadd.f32 %v1497_v15, %v1449_v19 }
 0x253   : > { %v3695_v41 = vpop.f32.mrf.mxu2 }
 0x254   : > { %1692 = vmatmul.bf16.vlgmr.msra.gmra.mxu1 %v3562_v54  ;;  %1790 = vmatmul.bf16.vlgmr.msra.gmra.mxu3 %v3562_v54  ;;  %v1831_v54 = vmax.f32 %v1498_v26, 0.0 }
 0x255   : > { %v1468_v19 = vpop.f32.mrf.mxu0 }
 0x256   : > { %v1469_v37 = vadd.f32 %v1468_v19, %v3646_v3 }
 0x257   : > { %v1595_v33 = vpop.f32.mrf.mxu3 }
 0x258   : > { %v1596_v8 = vadd.f32 %v1595_v33, %v1547_v14  ;;  %1663 = vmatmul.bf16.gmra.mxu0 %v3592_v60  ;;  %1761 = vmatmul.bf16.gmra.mxu2 %v3592_v60  ;;  %v1554_v33 = vadd.f32 %v1553_v30, %v3702_v35 }
 0x259   : > { %v1499_v63 = vpop.f32.mrf.mxu1 }
 0x25a   : > { %v1500_v25 = vadd.f32 %v1499_v63, %v1451_v61  ;;  %v1832_v42 = vmax.f32 %v1596_v8, 0.0 }
 0x25b   : > { %v3707_v15 = vpop.f32.mrf.mxu2 }
 0x25c   : > { %v1835_v0 = vmax.f32 %v1500_v25, 0.0  ;;  %v1567_v19 = vadd.f32 %v3707_v15, %v3646_v3  ;;  %v1933_v15 = vld [vmem:[%s4046_s5 + $0x10] sm:$0xff] }
 0x25d   : > { %v3713_v60 = vpop.f32.mrf.mxu0  ;;  %1947 = vperm.xlu1 %2847, %v1933_v15  }
 0x25e   : > { %v3691_v45 = vpack.c.bf16 %v1835_v0, %v1831_v54 }
 0x25f   : > { %v1597_v29 = vpop.f32.mrf.mxu3 }
 0x260   : > { %v1598_v1 = vadd.f32 %v1597_v29, %v1549_v44  ;;  %v1461_v29 = vadd.f32 %v3673_v38, %v3656_v34 }
 0x261   : > { %v1502_v50 = vpop.f32.mrf.mxu1 }
 0x262   : > { %v1503_v13 = vadd.f32 %v1502_v50, %v1454_v11  ;;  %v1836_v23 = vmax.f32 %v1598_v1, 0.0 }
 0x263   : > { %v3715_v5 = vpop.f32.mrf.mxu2 }
 0x264   : > { %1697 = vmatmul.bf16.gmra.mxu1 %v3582_v56  ;;  %1795 = vmatmul.bf16.gmra.mxu3 %v3582_v56  ;;  %v3700_v53 = vpack.c.bf16 %v1836_v23, %v1832_v42  ;;  %v1839_v56 = vmax.f32 %v1503_v13, 0.0 }
 0x265   : > { %v3727_v13 = vpop.f32.mrf.mxu0 }
 0x266   : > { %v1474_v35 = vadd.f32 %v3727_v13, %v3630_v20 }
 0x267   : > { %v1600_v48 = vpop.f32.mrf.mxu3 }
 0x268   : > { %v1601_v31 = vadd.f32 %v1600_v48, %v1552_v28  ;;  %1668 = vmatmul.bf16.gmra.mxu0 %v3606_v40  ;;  %1766 = vmatmul.bf16.gmra.mxu2 %v3606_v40  ;;  %v1559_v48 = vadd.f32 %v3675_v57, %v3656_v34 }
 0x269   : > { %v1504_v59 = vpop.f32.mrf.mxu1 }
 0x26a   : > { %v1505_v26 = vadd.f32 %v1504_v59, %v1456_v55  ;;  %v1840_v0 = vmax.f32 %v1601_v31, 0.0 }
 0x26b   : > { %v3729_v42 = vpop.f32.mrf.mxu2 }
 0x26c   : > { %v1843_v14 = vmax.f32 %v1505_v26, 0.0 }
 0x26d   : > { %v3736_v38 = vpop.f32.mrf.mxu0 }
 0x26e   : > { %v3711_v61 = vpack.c.bf16 %v1843_v14, %v1839_v56  ;;  %v1476_v3 = vadd.f32 %v3736_v38, %v3638_v62  ;;  %v1471_v38 = vadd.f32 %v3713_v60, %v3671_v16 }
 0x26f   : > { %v1602_v8 = vpop.f32.mrf.mxu3 }
 0x270   : > { %v1603_v63 = vadd.f32 %v1602_v8, %v1554_v33  ;;  %v1466_v8 = vadd.f32 %v3693_v32, %v3654_v27 }
 0x271   : > { %v1507_v25 = vpop.f32.mrf.mxu1 }
 0x272   : > { %v1508_v54 = vadd.f32 %v1507_v25, %v1459_v9  ;;  %v1844_v11 = vmax.f32 %v1603_v63, 0.0 }
 0x273   : > { %v3738_v9 = vpop.f32.mrf.mxu2 }
 0x274   : > { %1702 = vmatmul.bf16.gmra.mxu1 %v3602_v43  ;;  %1800 = vmatmul.bf16.gmra.mxu3 %v3602_v43  ;;  %v3721_v30 = vpack.c.bf16 %v1844_v11, %v1840_v0  ;;  %v1847_v23 = vmax.f32 %v1508_v54, 0.0 }
 0x275   : > { %v3750_v54 = vpop.f32.mrf.mxu0 }
 0x277   : > { %v1605_v44 = vpop.f32.mrf.mxu3 }
 0x278   : > { %v1606_v1 = vadd.f32 %v1605_v44, %v1557_v47  ;;  %1673 = vmatmul.bf16.gmra.mxu0 %v3614_v58  ;;  %1771 = vmatmul.bf16.gmra.mxu2 %v3614_v58  ;;  %v1564_v44 = vadd.f32 %v3695_v41, %v3654_v27 }
 0x279   : > { %v1509_v50 = vpop.f32.mrf.mxu1 }
 0x27a   : > { %v1510_v43 = vadd.f32 %v1509_v50, %v1461_v29  ;;  %v1848_v56 = vmax.f32 %v1606_v1, 0.0 }
 0x27b   : > { %v3752_v47 = vpop.f32.mrf.mxu2 }
 0x27c   : > { %v1851_v28 = vmax.f32 %v1510_v43, 0.0 }
 0x27d   : > { %v1480_v32 = vpop.f32.mrf.mxu0 }
 0x27e   : > { %v3734_v55 = vpack.c.bf16 %v1851_v28, %v1847_v23 }
 0x27f   : > { %v1607_v40 = vpop.f32.mrf.mxu3 }
 0x280   : > { %v1608_v31 = vadd.f32 %v1607_v40, %v1559_v48 }
 0x281   : > { %v1512_v59 = vpop.f32.mrf.mxu1 }
 0x282   : > { %v1513_v26 = vadd.f32 %v1512_v59, %v1464_v21  ;;  %v1852_v14 = vmax.f32 %v1608_v31, 0.0 }
 0x283   : > { %v1578_v48 = vpop.f32.mrf.mxu2 }
 0x284   : > { %1707 = vmatmul.bf16.gmra.mxu1 %v3610_v4  ;;  %1805 = vmatmul.bf16.gmra.mxu3 %v3610_v4  ;;  %v3744_v57 = vpack.c.bf16 %v1852_v14, %v1848_v56  ;;  %v1855_v11 = vmax.f32 %v1513_v26, 0.0 }
 0x285   : > { %v1483_v59 = vpop.f32.mrf.mxu0 }
 0x287   : > { %v1610_v33 = vpop.f32.mrf.mxu3 }
 0x288   : > { %v1611_v63 = vadd.f32 %v1610_v33, %v1562_v24  ;;  %1678 = vmatmul.bf16.gmra.mxu0 %v3622_v36  ;;  %1776 = vmatmul.bf16.gmra.mxu2 %v3622_v36  ;;  %v1931_v24 = vld [vmem:[%s4046_s5] sm:$0xff] }
 0x289   : > { %v1514_v25 = vpop.f32.mrf.mxu1  ;;  %1937 = vperm.xlu0 %2846, %v1931_v24   ;;  %v2068_v24 = vld [vmem:[%s4048_s7] sm:$0xff] }
 0x28a   : > { %v1515_v0 = vadd.f32 %v1514_v25, %v1466_v8  ;;  %v1856_v23 = vmax.f32 %v1611_v63, 0.0  ;;  %v1932_v63 = vld [vmem:[%s4046_s5 + $0x8] sm:$0xff] }
 0x28b   : > { %1942 = vperm.xlu1 %2847, %v1932_v63   ;;  %v1479_v63 = vadd.f32 %v3750_v54, %v3650_v6 }
 0x28c   : > { %v1859_v4 = vmax.f32 %v1515_v0, 0.0 }
 0x28d   : > { %v1485_v14 = vpop.f32.mrf.mxu0 }
 0x28e   : > { %v3757_v29 = vpack.c.bf16 %v1859_v4, %v1855_v11  ;;  %v2223_v4 = vld [vmem:[%s4052_s11] sm:$0x3] }
 0x28f   : > { %v1612_v58 = vpop.f32.mrf.mxu3 }
 0x290   : > { %v1613_v1 = vadd.f32 %v1612_v58, %v1564_v44 }
 0x291   : > { %v1517_v50 = vpop.f32.mrf.mxu1 }
 0x292   : > { %v3759_v43 = vadd.f32 %v1517_v50, %v1469_v37  ;;  %v1860_v28 = vmax.f32 %v1613_v1, 0.0 }
 0x293   : > { %2226 = vperm.xlu1 %2847, %v2223_v4   ;;  %v1481_v4 = vadd.f32 %v1480_v32, %v3662_v2  ;;  %v1577_v32 = vadd.f32 %v3752_v47, %v3650_v6  ;;  %v1572_v47 = vadd.f32 %v3729_v42, %v3630_v20 }
 0x294   : > { %1712 = vmatmul.bf16.gmra.mxu1 %v3618_v49  ;;  %1810 = vmatmul.bf16.gmra.mxu3 %v3618_v49  ;;  %v3765_v21 = vpack.c.bf16 %v1860_v28, %v1856_v23  ;;  %v1581_v49 = vpop.f32.mrf.mxu2  ;;  %v1934_v28 = vld [vmem:[%s4046_s5 + $0x18] sm:$0xff] }
 0x295   : > { %v1644_v0 = vpop.f32.mrf.mxu0  ;;  %1952 = vperm.xlu2 %2848, %v1934_v28   ;;  %v1486_v28 = vadd.f32 %v1485_v14, %v3636_v12  ;;  %v1579_v14 = vadd.f32 %v1578_v48, %v3662_v2 }
 0x296   : > { %v1645_v13 = vadd.f32 %v1644_v0, %v3668_v18 }
 0x297   : > { %v1615_v41 = vpop.f32.mrf.mxu3 }
 0x298   : > { %v3769_v40 = vadd.f32 %v1615_v41, %v1567_v19 }
 0x299   : > { %v3771_v31 = vpop.f32.mrf.mxu1 }
 0x29a   : > { %v1520_v60 = vadd.f32 %v3771_v31, %v1471_v38 }
 0x29c   : > { %v1583_v8 = vpop.f32.mrf.mxu2 }
 0x29d   : > { %v3802_v1 = vpop.f32.mrf.mxu0  ;;  %2071 = vperm.xlu2 %2848, %v2068_v24   ;;  %v1584_v24 = vadd.f32 %v1583_v8, %v3636_v12 }
 0x29e   : > { %4114 = vst [vmem:[#allocation25_spill] sm:$0xff] %v3802_v1  ;;  %v1582_v1 = vadd.f32 %v1581_v49, %v3628_v7 }
 0x29f   : > { %v3773_v26 = vpop.f32.mrf.mxu3 }
 0x2a1   : > { %v3775_v56 = vpop.f32.mrf.mxu1 }
 0x2a4   : > { %1717 = vmatmul.bf16.gmra.mxu1 %v3626_v51  ;;  %1815 = vmatmul.bf16.gmra.mxu3 %v3626_v51  ;;  %v2139_v51 = vld [vmem:[%s4050_s9] sm:$0xf]  ;;  %v3800_v37 = vpop.f32.mrf.mxu2 }
 0x2a5   : > { %2142 = vperm.xlu0 %2846, %v2139_v51   ;;  %v3809_v41 = vpop.f32.mrf.mxu0 }
 0x2a7   : > { %v3782_v36 = vpop.f32.mrf.mxu3 }
 0x2a9   : > { %v1524_v33 = vpop.f32.mrf.mxu1 }
 0x2aa   : > { %v1525_v27 = vadd.f32 %v1524_v33, %v1476_v3 }
 0x2ac   : > { %v3804_v23 = vpop.f32.mrf.mxu2  ;;  %v1875_v0 = vmax.f32 %v1525_v27, 0.0  ;;  %v1569_v27 = vadd.f32 %v3715_v5, %v3671_v16 }
 0x2ad   : > { %4115 = vst [vmem:[#allocation26_spill] sm:$0xff] %v3804_v23  ;;  %v3832_v49 = vpop.f32.mrf.mxu0 }
 0x2af   : > { %v3790_v25 = vpop.f32.mrf.mxu3 }
 0x2b1   : > { %v1527_v11 = vpop.f32.mrf.mxu1 }
 0x2b4   : > { %1722 = vmatmul.bf16.gmra.mxu1 %v3640_v22  ;;  %1820 = vmatmul.bf16.gmra.mxu3 %v3640_v22  ;;  %v1484_v22 = vadd.f32 %v1483_v59, %v3628_v7  ;;  %v3821_v59 = vpop.f32.mrf.mxu2 }
 0x2b7   : > { %v1625_v44 = vpop.f32.mrf.mxu3 }
 0x2b9   : > { %v1529_v58 = vpop.f32.mrf.mxu1 }
 0x2ba   : > { %v1530_v39 = vadd.f32 %v1529_v58, %v1481_v4 }
 0x2bc   : > { %v1883_v4 = vmax.f32 %v1530_v39, 0.0  ;;  %v1574_v39 = vadd.f32 %v3738_v9, %v3638_v62  ;;  %v3845_v42 = vpop.f32.mrf.mxu2 }
 0x2be   : > { %v1623_v9 = vadd.f32 %v3790_v25, %v1574_v39  ;;  %v1618_v25 = vadd.f32 %v3773_v26, %v1569_v27 }
 0x2bf   : > { %v1627_v50 = vpop.f32.mrf.mxu3 }
 0x2c0   : > { %v1628_v33 = vadd.f32 %v1627_v50, %v1579_v14  ;;  %v1743_v50 = vadd.f32 %v3800_v37, %v3668_v18  ;;  %v1876_v37 = vmax.f32 %v1623_v9, 0.0 }
 0x2c1   : > { %v1532_v19 = vpop.f32.mrf.mxu1 }
 0x2c2   : > { %v1533_v51 = vadd.f32 %v1532_v19, %v1484_v22  ;;  %v1528_v22 = vadd.f32 %v1527_v11, %v1479_v63  ;;  %v1523_v11 = vadd.f32 %v3775_v56, %v1474_v35  ;;  %v2305_v63 = vld [vmem:[#allocation2] sm:$0x1] }
 0x2c3   : > { %2308 = vperm.xlu2 %2848, %v2305_v63  }
 0x2c4   : > { %1727 = vmatmul.bf16.gmra.mxu1 %v3652_v17  ;;  %1825 = vmatmul.bf16.gmra.mxu3 %v3652_v17  ;;  %v1887_v54 = vmax.f32 %v1533_v51, 0.0  ;;  %v1879_v3 = vmax.f32 %v1528_v22, 0.0  ;;  %v1867_v22 = vmax.f32 %v1520_v60, 0.0 }
 0x2c6   : > { %v1919_v35 = vpack.c.bf16 %v1883_v4, %v1879_v3 }
 0x2c7   : > { %v1630_v15 = vpop.f32.mrf.mxu3 }
 0x2c8   : > { %v1631_v58 = vadd.f32 %v1630_v15, %v1582_v1  ;;  %v1626_v1 = vadd.f32 %v1625_v44, %v1577_v32  ;;  %v1621_v32 = vadd.f32 %v3782_v36, %v1572_v47  ;;  %v1752_v36 = vpop.f32.mrf.mxu2 }
 0x2c9   : > { %v1534_v23 = vpop.f32.mrf.mxu1 }
 0x2ca   : > { %v1535_v17 = vadd.f32 %v1534_v23, %v1486_v28  ;;  %v1888_v15 = vmax.f32 %v1631_v58, 0.0  ;;  %v1880_v44 = vmax.f32 %v1626_v1, 0.0  ;;  %v1654_v58 = vpop.f32.mrf.mxu0 }
 0x2cc   : > { %v1891_v19 = vmax.f32 %v1535_v17, 0.0  ;;  %v1871_v17 = vmax.f32 %v1523_v11, 0.0  ;;  %v1864_v11 = vmax.f32 %v3769_v40, 0.0 }
 0x2ce   : > { %v1923_v23 = vpack.c.bf16 %v1891_v19, %v1887_v54  ;;  %v1884_v19 = vmax.f32 %v1628_v33, 0.0  ;;  %v1915_v31 = vpack.c.bf16 %v1875_v0, %v1871_v17  ;;  %v1748_v33 = vadd.f32 %v3821_v59, %v3666_v10 }
 0x2cf   : > { %v1632_v51 = vpop.f32.mrf.mxu3 }
 0x2d0   : > { %v1633_v48 = vadd.f32 %v1632_v51, %v1584_v24  ;;  %1967 = vmatpush.bf16.msrb.mxu0 %v1923_v23  ;;  %v1863_v24 = vmax.f32 %v3759_v43, 0.0  ;;  %v1920_v18 = vpack.c.bf16 %v1884_v19, %v1880_v44  ;;  %v1868_v51 = vmax.f32 %v1618_v25, 0.0  ;;  %v1754_v39 = vpop.f32.mrf.mxu2 }
 0x2d1   : > { %v1693_v8 = vpop.f32.mrf.mxu1  ;;  %v1650_v43 = vadd.f32 %v3809_v41, %v3666_v10  ;;  %v1655_v10 = vadd.f32 %v1654_v58, %v3687_v46 }
 0x2d2   : > { %v1892_v28 = vmax.f32 %v1633_v48, 0.0  ;;  %v3843_v56 = vadd.f32 %v1693_v8, %v1645_v13  ;;  %v1911_v5 = vpack.c.bf16 %v1867_v22, %v1863_v24  ;;  %v1872_v13 = vmax.f32 %v1621_v32, 0.0  ;;  %v1656_v48 = vpop.f32.mrf.mxu0  ;;  %v3880_v8 = vld [vmem:[%s4045_s4] sm:$0xff] }
 0x2d3   : > { %v1912_v26 = vpack.c.bf16 %v1868_v51, %v1864_v11 }
 0x2d4   : > { %v1924_v54 = vpack.c.bf16 %v1892_v28, %v1888_v15  ;;  %1968 = vmatpush.bf16.msrb.mxu0 %v1919_v35  ;;  %v1916_v38 = vpack.c.bf16 %v1876_v37, %v1872_v13  ;;  %v3895_v35 = vld [vmem:[%s4045_s4 + $0x8] sm:$0xff] }
 0x2d5   : > { %4116 = vst [vmem:[#allocation19_spill] sm:$0xff] %v3895_v35 }
 0x2d6   : > { %1986 = vmatpush.bf16.msrb.mxu1 %v1924_v54 }
 0x2d7   : > { %v1791_v14 = vpop.f32.mrf.mxu3 }
 0x2d8   : > { %v3854_v23 = vadd.f32 %v1791_v14, %v1743_v50  ;;  %1969 = vmatpush.bf16.msrb.mxu0 %v1915_v31  ;;  %v1757_v59 = vpop.f32.mrf.mxu2 }
 0x2d9   : > { %v3857_v4 = vpop.f32.mrf.mxu1  ;;  %v1758_v58 = vadd.f32 %v1757_v59, %v3648_v52 }
 0x2da   : > { %1987 = vmatpush.bf16.msrb.mxu1 %v1920_v18 }
 0x2dc   : > { %1970 = vmatpush.bf16.msrb.mxu0 %v1911_v5 }
 0x2de   : > { %1988 = vmatpush.bf16.msrb.mxu1 %v1916_v38 }
 0x2df   : > { %v3862_v63 = vpop.f32.mrf.mxu3 }
 0x2e0   : > { %1971 = vmatpush.bf16.msrb.mxu0 %v3757_v29  ;;  %v1759_v17 = vpop.f32.mrf.mxu2 }
 0x2e1   : > { %v1698_v47 = vpop.f32.mrf.mxu1 }
 0x2e2   : > { %v3865_v3 = vadd.f32 %v1698_v47, %v1650_v43  ;;  %1989 = vmatpush.bf16.msrb.mxu1 %v1912_v26  ;;  %v4118_v47 = vld [vmem:[#allocation27_spill] sm:$0xff] }
 0x2e4   : > { %1972 = vmatpush.bf16.msrb.mxu0 %v3734_v55  ;;  %v1659_v55 = vpop.f32.mrf.mxu0 }
 0x2e5   : > { %v1660_v19 = vadd.f32 %v1659_v55, %v3648_v52 }
 0x2e6   : > { %1990 = vmatpush.bf16.msrb.mxu1 %v3765_v21 }
 0x2e7   : > { %v1796_v41 = vpop.f32.mrf.mxu3 }
 0x2e8   : > { %v3871_v40 = vadd.f32 %v1796_v41, %v1748_v33  ;;  %1973 = vmatpush.bf16.msrb.mxu0 %v3711_v61  ;;  %v1762_v18 = vpop.f32.mrf.mxu2 }
 0x2e9   : > { %v3874_v29 = vpop.f32.mrf.mxu1 }
 0x2ea   : > { %1991 = vmatpush.bf16.msrb.mxu1 %v3744_v57  ;;  %v1753_v57 = vadd.f32 %v1752_v36, %v3687_v46  ;;  %v1755_v46 = vadd.f32 %v1754_v39, %v3656_v34 }
 0x2ec   : > { %1974 = vmatpush.bf16.msrb.mxu0 %v3691_v45  ;;  %v1661_v1 = vpop.f32.mrf.mxu0  ;;  %v1657_v45 = vadd.f32 %v1656_v48, %v3656_v34  ;;  %v4117_v34 = vld [vmem:[#allocation28_spill] sm:$0xff] }
 0x2ed   : > { %v1662_v25 = vadd.f32 %v1661_v1, %v4117_v34  ;;  %v1760_v26 = vadd.f32 %v1759_v17, %v4117_v34 }
 0x2ee   : > { %1992 = vmatpush.bf16.msrb.mxu1 %v3721_v30 }
 0x2ef   : > { %v3885_v21 = vpop.f32.mrf.mxu3  ;;  %1975 = vmatmul.bf16.vlgmr.msrb.gmra.mxu0 %v3880_v8 }
 0x2f0   : > { %v3913_v33 = vpop.f32.mrf.mxu2 }
 0x2f1   : > { %v1703_v61 = vpop.f32.mrf.mxu1 }
 0x2f2   : > { %v1704_v0 = vadd.f32 %v1703_v61, %v1655_v10  ;;  %1993 = vmatpush.bf16.msrb.mxu1 %v3700_v53 }
 0x2f4   : > { %v1849_v54 = vmax.f32 %v1704_v0, 0.0  ;;  %v1664_v27 = vpop.f32.mrf.mxu0 }
 0x2f5   : > { %1994 = vmatmul.bf16.vlgmr.msrb.gmra.mxu1 %v3880_v8  ;;  %v1665_v48 = vadd.f32 %v1664_v27, %v4118_v47 }
 0x2f7   : > { %v1801_v60 = vpop.f32.mrf.mxu3 }
 0x2f8   : > { %v1802_v30 = vadd.f32 %v1801_v60, %v1753_v57  ;;  %v1763_v57 = vadd.f32 %v1762_v18, %v4118_v47 }
 0x2f9   : > { %v1705_v15 = vpop.f32.mrf.mxu1 }
 0x2fa   : > { %v1706_v28 = vadd.f32 %v1705_v15, %v1657_v45  ;;  %v1850_v22 = vmax.f32 %v1802_v30, 0.0  ;;  %v1767_v30 = vpop.f32.mrf.mxu2 }
 0x2fc   : > { %v1853_v50 = vmax.f32 %v1706_v28, 0.0  ;;  %v3907_v38 = vpop.f32.mrf.mxu0 }
 0x2fe   : > { %v3897_v53 = vpack.c.bf16 %v1853_v50, %v1849_v54 }
 0x2ff   : > { %v1803_v9 = vpop.f32.mrf.mxu3  ;;  %1980 = vmatmul.bf16.gmra.mxu0 %v3895_v35 }
 0x300   : > { %v1804_v31 = vadd.f32 %v1803_v9, %v1755_v46 }
 0x301   : > { %v1708_v44 = vpop.f32.mrf.mxu1 }
 0x302   : > { %v1854_v32 = vmax.f32 %v1804_v31, 0.0  ;;  %v1709_v14 = vadd.f32 %v1708_v44, %v1660_v19  ;;  %v1769_v54 = vpop.f32.mrf.mxu2 }
 0x304   : > { %v3902_v24 = vpack.c.bf16 %v1854_v32, %v1850_v22  ;;  %v1857_v36 = vmax.f32 %v1709_v14, 0.0  ;;  %v1669_v59 = vpop.f32.mrf.mxu0 }
 0x305   : > { %1999 = vmatmul.bf16.gmra.mxu1 %v3895_v35 }
 0x307   : > { %v1806_v37 = vpop.f32.mrf.mxu3 }
 0x308   : > { %v1807_v5 = vadd.f32 %v1806_v37, %v1758_v58 }
 0x309   : > { %v1710_v13 = vpop.f32.mrf.mxu1 }
 0x30a   : > { %v1711_v51 = vadd.f32 %v1710_v13, %v1662_v25  ;;  %v1858_v55 = vmax.f32 %v1807_v5, 0.0  ;;  %v1772_v9 = vpop.f32.mrf.mxu2 }
 0x30c   : > { %v1861_v43 = vmax.f32 %v1711_v51, 0.0  ;;  %v1671_v15 = vpop.f32.mrf.mxu0 }
 0x30e   : > { %v3909_v11 = vpack.c.bf16 %v1861_v43, %v1857_v36 }
 0x30f   : > { %v1808_v52 = vpop.f32.mrf.mxu3 }
 0x310   : > { %v1809_v41 = vadd.f32 %v1808_v52, %v1760_v26 }
 0x311   : > { %v1713_v39 = vpop.f32.mrf.mxu1 }
 0x312   : > { %v1862_v10 = vmax.f32 %v1809_v41, 0.0  ;;  %v3915_v61 = vadd.f32 %v1713_v39, %v1665_v48  ;;  %v1774_v32 = vpop.f32.mrf.mxu2  ;;  %v1670_v41 = vadd.f32 %v1669_v59, %v3630_v20  ;;  %v1672_v39 = vadd.f32 %v1671_v15, %v3638_v62 }
 0x313   : > { %v1667_v59 = vadd.f32 %v3907_v38, %v3671_v16 }
 0x314   : > { %v3917_v0 = vpack.c.bf16 %v1862_v10, %v1858_v55  ;;  %v1674_v46 = vpop.f32.mrf.mxu0 }
 0x315   : > { %v1675_v51 = vadd.f32 %v1674_v46, %v3650_v6  ;;  %v1773_v46 = vadd.f32 %v1772_v9, %v3650_v6 }
 0x317   : > { %v1811_v1 = vpop.f32.mrf.mxu3 }
 0x318   : > { %v3920_v60 = vadd.f32 %v1811_v1, %v1763_v57 }
 0x319   : > { %v1715_v45 = vpop.f32.mrf.mxu1 }
 0x31a   : > { %v1777_v34 = vpop.f32.mrf.mxu2 }
 0x31b   : > { %v1778_v1 = vadd.f32 %v1777_v34, %v3628_v7 }
 0x31c   : > { %v1676_v44 = vpop.f32.mrf.mxu0 }
 0x31d   : > { %v1677_v36 = vadd.f32 %v1676_v44, %v3662_v2  ;;  %v1775_v44 = vadd.f32 %v1774_v32, %v3662_v2  ;;  %v1770_v2 = vadd.f32 %v1769_v54, %v3638_v62 }
 0x31f   : > { %v3922_v28 = vpop.f32.mrf.mxu3 }
 0x321   : > { %v1718_v17 = vpop.f32.mrf.mxu1 }
 0x322   : > { %v1779_v55 = vpop.f32.mrf.mxu2 }
 0x324   : > { %v1679_v58 = vpop.f32.mrf.mxu0 }
 0x325   : > { %v1680_v25 = vadd.f32 %v1679_v58, %v3628_v7  ;;  %v1716_v7 = vadd.f32 %v1715_v45, %v1667_v59 }
 0x327   : > { %v1816_v50 = vpop.f32.mrf.mxu3 }
 0x329   : > { %v1720_v19 = vpop.f32.mrf.mxu1 }
 0x32a   : > { %v1721_v35 = vadd.f32 %v1720_v19, %v1672_v39  ;;  %v1768_v19 = vadd.f32 %v1767_v30, %v3630_v20  ;;  %v1865_v20 = vmax.f32 %v3915_v61, 0.0  ;;  %v4120_v61 = vld [vmem:[#allocation23_spill] sm:$0xff] }
 0x32c   : > { %v1681_v5 = vpop.f32.mrf.mxu0  ;;  %v1877_v6 = vmax.f32 %v1721_v35, 0.0 }
 0x32d   : > { %v1682_v26 = vadd.f32 %v1681_v5, %v3636_v12 }
 0x32f   : > { %v1818_v27 = vpop.f32.mrf.mxu3 }
 0x331   : > { %v1723_v31 = vpop.f32.mrf.mxu1 }
 0x332   : > { %v1724_v10 = vadd.f32 %v1723_v31, %v1675_v51 }
 0x334   : > { %v1881_v31 = vmax.f32 %v1724_v10, 0.0 }
 0x337   : > { %v1821_v22 = vpop.f32.mrf.mxu3 }
 0x338   : > { %v1822_v9 = vadd.f32 %v1821_v22, %v1773_v46  ;;  %v4119_v22 = vld [vmem:[#allocation24_spill] sm:$0xff]  ;;  %v4122_v46 = vld [vmem:[#allocation26_spill] sm:$0xff] }
 0x339   : > { %v1725_v14 = vpop.f32.mrf.mxu1 }
 0x33a   : > { %v1726_v48 = vadd.f32 %v1725_v14, %v1677_v36  ;;  %v1780_v14 = vadd.f32 %v1779_v55, %v3636_v12  ;;  %v1719_v36 = vadd.f32 %v1718_v17, %v1670_v41  ;;  %v1765_v17 = vadd.f32 %v3913_v33, %v3671_v16  ;;  %v4121_v55 = vld [vmem:[#allocation25_spill] sm:$0xff] }
 0x33b   : > { %v1652_v41 = vadd.f32 %v3832_v49, %v4119_v22  ;;  %v1750_v49 = vadd.f32 %v3845_v42, %v4119_v22  ;;  %v1833_v42 = vmax.f32 %v3843_v56, 0.0 }
 0x33c   : > { %v1873_v12 = vmax.f32 %v1719_v36, 0.0  ;;  %v1814_v62 = vadd.f32 %v3922_v28, %v1765_v17  ;;  %v1647_v28 = vadd.f32 %v4121_v55, %v4120_v61 }
 0x33d   : > { %v1701_v33 = vadd.f32 %v3874_v29, %v1652_v41  ;;  %v1799_v29 = vadd.f32 %v3885_v21, %v1750_v49 }
 0x33e   : > { %v1917_v45 = vpack.c.bf16 %v1877_v6, %v1873_v12  ;;  %v1870_v39 = vmax.f32 %v1814_v62, 0.0  ;;  %v1938_v6 = vpop.permute.xlu0 %1937 }
 0x33f   : > { %v1823_v18 = vpop.f32.mrf.mxu3 }
 0x340   : > { %v1824_v51 = vadd.f32 %v1823_v18, %v1775_v44  ;;  %v1869_v18 = vmax.f32 %v1716_v7, 0.0  ;;  %v1745_v44 = vadd.f32 %v4122_v46, %v4120_v61 }
 0x341   : > { %v1728_v37 = vpop.f32.mrf.mxu1 }
 0x342   : > { %v1729_v43 = vadd.f32 %v1728_v37, %v1680_v25  ;;  %v1885_v37 = vmax.f32 %v1726_v48, 0.0  ;;  %v1817_v48 = vadd.f32 %v1816_v50, %v1768_v19  ;;  %v1913_v54 = vpack.c.bf16 %v1869_v18, %v1865_v20  ;;  %v2067_v20 = vld [vmem:[%s4047_s6] sm:$0xf] }
 0x343   : > { %v1866_v50 = vmax.f32 %v3920_v60, 0.0 }
 0x344   : > { %v1889_v57 = vmax.f32 %v1729_v43, 0.0  ;;  %v1921_v32 = vpack.c.bf16 %v1885_v37, %v1881_v31  ;;  %v1846_v37 = vmax.f32 %v1799_v29, 0.0  ;;  %v1953_v31 = vpop.permute.xlu2 %1952 }
 0x345   : > { %v1914_v10 = vpack.c.bf16 %v1870_v39, %v1866_v50 }
 0x347   : > { %v1826_v13 = vpop.f32.mrf.mxu3 }
 0x348   : > { %v1827_v25 = vadd.f32 %v1826_v13, %v1778_v1  ;;  %v1845_v1 = vmax.f32 %v1701_v33, 0.0 }
 0x349   : > { %v1730_v47 = vpop.f32.mrf.mxu1 }
 0x34a   : > { %v1731_v52 = vadd.f32 %v1730_v47, %v1682_v26  ;;  %v1890_v34 = vmax.f32 %v1827_v25, 0.0  ;;  %v1819_v26 = vadd.f32 %v1818_v27, %v1770_v2  ;;  %v1886_v47 = vmax.f32 %v1824_v51, 0.0 }
 0x34b   : > { %v1874_v27 = vmax.f32 %v1817_v48, 0.0  ;;  %v1842_v25 = vmax.f32 %v3871_v40, 0.0  ;;  %v1948_v40 = vpop.permute.xlu1 %1947 }
 0x34c   : > { %v1893_v58 = vmax.f32 %v1731_v52, 0.0  ;;  %v1882_v52 = vmax.f32 %v1822_v9, 0.0  ;;  %v1878_v35 = vmax.f32 %v1819_v26, 0.0 }
 0x34e   : > { %v1925_v5 = vpack.c.bf16 %v1893_v58, %v1889_v57  ;;  %v1922_v30 = vpack.c.bf16 %v1886_v47, %v1882_v52  ;;  %v1918_v16 = vpack.c.bf16 %v1878_v35, %v1874_v27  ;;  %v1696_v57 = vadd.f32 %v3857_v4, %v1647_v28 }
 0x34f   : > { %v1828_v15 = vpop.f32.mrf.mxu3  ;;  %v1841_v58 = vmax.f32 %v3865_v3, 0.0  ;;  %v1794_v4 = vadd.f32 %v3862_v63, %v1745_v44 }
 0x350   : > { %v1829_v43 = vadd.f32 %v1828_v15, %v1780_v14  ;;  %2005 = vmatpush.bf16.msrb.mxu2 %v1925_v5  ;;  %v1837_v60 = vmax.f32 %v1696_v57, 0.0  ;;  %v1902_v5 = vpack.c.bf16 %v1846_v37, %v1842_v25  ;;  %v1834_v14 = vmax.f32 %v3854_v23, 0.0 }
 0x351   : > { %v1838_v21 = vmax.f32 %v1794_v4, 0.0 }
 0x352   : > { %v1894_v13 = vmax.f32 %v1829_v43, 0.0  ;;  %v1897_v3 = vpack.c.bf16 %v1837_v60, %v1833_v42 }
 0x353   : > { %v1943_v7 = vpop.permute.xlu1 %1942 }
 0x354   : > { %v1926_v38 = vpack.c.bf16 %v1894_v13, %v1890_v34  ;;  %2006 = vmatpush.bf16.msrb.mxu2 %v1921_v32 }
 0x356   : > { %2024 = vmatpush.bf16.msrb.mxu3 %v1926_v38 }
 0x358   : > { %2007 = vmatpush.bf16.msrb.mxu2 %v1917_v45 }
 0x35a   : > { %2025 = vmatpush.bf16.msrb.mxu3 %v1922_v30 }
 0x35c   : > { %2008 = vmatpush.bf16.msrb.mxu2 %v1913_v54 }
 0x35e   : > { %2026 = vmatpush.bf16.msrb.mxu3 %v1918_v16 }
 0x360   : > { %2009 = vmatpush.bf16.msrb.mxu2 %v3909_v11  ;;  %v1901_v11 = vpack.c.bf16 %v1845_v1, %v1841_v58  ;;  %v2072_v1 = vpop.permute.xlu2 %2071 }
 0x362   : > { %2027 = vmatpush.bf16.msrb.mxu3 %v1914_v10 }
 0x364   : > { %2010 = vmatpush.bf16.msrb.mxu2 %v3897_v53 }
 0x366   : > { %2028 = vmatpush.bf16.msrb.mxu3 %v3917_v0  ;;  %v1898_v0 = vpack.c.bf16 %v1838_v21, %v1834_v14 }
 0x368   : > { %2011 = vmatpush.bf16.msrb.mxu2 %v1901_v11 }
 0x36a   : > { %2029 = vmatpush.bf16.msrb.mxu3 %v3902_v24  ;;  %v4123_v24 = vld [vmem:[#allocation19_spill] sm:$0xff] }
 0x36c   : > { %v1976_v53 = vpop.f32.mrf.mxu0  ;;  %2012 = vmatpush.bf16.msrb.mxu2 %v1897_v3 }
 0x36d   : > { %v1977_v32 = vadd.f32 %v1976_v53, %v1938_v6 }
 0x36e   : > { %2030 = vmatpush.bf16.msrb.mxu3 %v1902_v5 }
 0x36f   : > { %2013 = vmatmul.bf16.vlgmr.msrb.gmra.mxu2 %v3880_v8  ;;  %v2043_v38 = vmax.f32 %v1977_v32, 0.0 }
 0x372   : > { %v1995_v63 = vpop.f32.mrf.mxu1  ;;  %2031 = vmatpush.bf16.msrb.mxu3 %v1898_v0 }
 0x373   : > { %v1996_v18 = vadd.f32 %v1995_v63, %v1938_v6 }
 0x374   : > { %v1978_v59 = vpop.f32.mrf.mxu0 }
 0x375   : > { %2032 = vmatmul.bf16.vlgmr.msrb.gmra.mxu3 %v3880_v8  ;;  %v1979_v19 = vadd.f32 %v1978_v59, %v1943_v7  ;;  %v2044_v35 = vmax.f32 %v1996_v18, 0.0 }
 0x377   : > { %v2047_v13 = vmax.f32 %v1979_v19, 0.0 }
 0x379   : > { %v2059_v45 = vpack.c.bf16 %v2047_v13, %v2043_v38 }
 0x37a   : > { %v1997_v56 = vpop.f32.mrf.mxu1 }
 0x37b   : > { %v1998_v26 = vadd.f32 %v1997_v56, %v1943_v7 }
 0x37c   : > { %v1981_v15 = vpop.f32.mrf.mxu0 }
 0x37d   : > { %v1982_v51 = vadd.f32 %v1981_v15, %v1948_v40  ;;  %v2048_v62 = vmax.f32 %v1998_v26, 0.0  ;;  %v2138_v15 = vld [vmem:[%s4049_s8] sm:$0x3] }
 0x37f   : > { %2018 = vmatmul.bf16.gmra.mxu2 %v4123_v24  ;;  %v2051_v2 = vmax.f32 %v1982_v51, 0.0  ;;  %v2060_v30 = vpack.c.bf16 %v2048_v62, %v2044_v35 }
 0x382   : > { %v2000_v36 = vpop.f32.mrf.mxu1 }
 0x383   : > { %v2001_v34 = vadd.f32 %v2000_v36, %v1948_v40 }
 0x384   : > { %v1983_v43 = vpop.f32.mrf.mxu0 }
 0x385   : > { %v1984_v23 = vadd.f32 %v1983_v43, %v1953_v31  ;;  %2037 = vmatmul.bf16.gmra.mxu3 %v4123_v24  ;;  %v2052_v17 = vmax.f32 %v2001_v34, 0.0 }
 0x387   : > { %v2055_v9 = vmax.f32 %v1984_v23, 0.0  ;;  %v2143_v23 = vpop.permute.xlu0 %2142 }
 0x389   : > { %v2063_v8 = vpack.c.bf16 %v2055_v9, %v2051_v2 }
 0x38a   : > { %v2002_v12 = vpop.f32.mrf.mxu1 }
 0x38b   : > { %v2003_v47 = vadd.f32 %v2002_v12, %v1953_v31  ;;  %2084 = vmatpush.bf16.msra.mxu0 %v2063_v8 }
 0x38d   : > { %v2056_v48 = vmax.f32 %v2003_v47, 0.0  ;;  %v2222_v47 = vld [vmem:[%s4051_s10] sm:$0x1] }
 0x38f   : > { %v2064_v52 = vpack.c.bf16 %v2056_v48, %v2052_v17  ;;  %2085 = vmatpush.bf16.msra.mxu0 %v2059_v45 }
 0x391   : > { %2097 = vmatpush.bf16.msra.mxu1 %v2064_v52 }
 0x392   : > { %2717 = vmatmul.msk.bf16.vlgmr.msra.gmra.mxu0 %vm2074_vm2, %v2067_v20 }
 0x395   : > { %2098 = vmatpush.bf16.msra.mxu1 %v2060_v30 }
 0x398   : > { %2718 = vmatmul.msk.bf16.vlgmr.msra.gmra.mxu1 %vm2074_vm2, %v2067_v20 }
 0x3f2   : > { %v2014_v54 = vpop.f32.mrf.mxu2 }
 0x3f3   : > { %v2015_v28 = vadd.f32 %v2014_v54, %v1938_v6 }
 0x3f5   : > { %v2045_v11 = vmax.f32 %v2015_v28, 0.0 }
 0x3f8   : > { %v2033_v27 = vpop.f32.mrf.mxu3 }
 0x3f9   : > { %v2034_v25 = vadd.f32 %v2033_v27, %v1938_v6 }
 0x3fa   : > { %v2016_v22 = vpop.f32.mrf.mxu2 }
 0x3fb   : > { %v2017_v61 = vadd.f32 %v2016_v22, %v1943_v7 }
 0x3fd   : > { %v2049_v49 = vmax.f32 %v2017_v61, 0.0 }
 0x3ff   : > { %v2061_v3 = vpack.c.bf16 %v2049_v49, %v2045_v11 }
 0x400   : > { %v2035_v41 = vpop.f32.mrf.mxu3 }
 0x401   : > { %v2036_v4 = vadd.f32 %v2035_v41, %v1943_v7 }
 0x402   : > { %v2019_v39 = vpop.f32.mrf.mxu2 }
 0x403   : > { %v2020_v33 = vadd.f32 %v2019_v39, %v1948_v40  ;;  %v2050_v14 = vmax.f32 %v2036_v4, 0.0  ;;  %v2227_v39 = vpop.permute.xlu1 %2226 }
 0x405   : > { %v2053_v10 = vmax.f32 %v2020_v33, 0.0 }
 0x408   : > { %v2038_v16 = vpop.f32.mrf.mxu3 }
 0x409   : > { %v2039_v58 = vadd.f32 %v2038_v16, %v1948_v40  ;;  %v2046_v40 = vmax.f32 %v2034_v25, 0.0 }
 0x40a   : > { %v2021_v50 = vpop.f32.mrf.mxu2 }
 0x40b   : > { %v2022_v55 = vadd.f32 %v2021_v50, %v1953_v31  ;;  %v2054_v21 = vmax.f32 %v2039_v58, 0.0 }
 0x40d   : > { %v2057_v57 = vmax.f32 %v2022_v55, 0.0 }
 0x40f   : > { %v2065_v29 = vpack.c.bf16 %v2057_v57, %v2053_v10  ;;  %v2087_v60 = vpop.f32.mrf.mxu0  ;;  %v2304_v57 = vld [vmem:[%s4053_s12] sm:$0x1] }
 0x410   : > { %v2088_v46 = vadd.f32 %v2087_v60, %v2072_v1  ;;  %v2040_v44 = vpop.f32.mrf.mxu3 }
 0x411   : > { %v2041_v37 = vadd.f32 %v2040_v44, %v1953_v31  ;;  %2110 = vmatpush.bf16.msra.mxu2 %v2065_v29  ;;  %v2062_v31 = vpack.c.bf16 %v2050_v14, %v2046_v40 }
 0x412   : > { %v2130_v42 = vmax.f32 %v2088_v46, 0.0 }
 0x413   : > { %v2058_v53 = vmax.f32 %v2041_v37, 0.0 }
 0x414   : > { %v2134_v5 = vpack.c.bf16 %v2130_v42, %v2130_v42 }
 0x415   : > { %v2066_v0 = vpack.c.bf16 %v2058_v53, %v2054_v21  ;;  %v2100_v63 = vpop.f32.mrf.mxu1  ;;  %2111 = vmatpush.bf16.msra.mxu2 %v2061_v3 }
 0x416   : > { %v2101_v59 = vadd.f32 %v2100_v63, %v2072_v1  ;;  %v2151_v56 = vsel %vm2149_vm3, %v2134_v5, 0  ;;  %v2309_v63 = vpop.permute.xlu2 %2308 }
 0x417   : > { %2123 = vmatpush.bf16.msra.mxu3 %v2066_v0  ;;  %2169 = vmatpush.bf16.msrb.mxu0 %v2151_v56  ;;  %v2089_v24 = vpop.f32.mrf.mxu0 }
 0x418   : > { %v2131_v36 = vmax.f32 %v2101_v59, 0.0  ;;  %2719 = vmatmul.msk.bf16.vlgmr.msra.gmra.mxu2 %vm2074_vm2, %v2067_v20  ;;  %v2311_v59 = vperm.slane %v2309_v63, 0 }
 0x41a   : > { %v2135_v51 = vpack.c.bf16 %v2131_v36, %v2131_v36  ;;  %2721 = vmatmul.msk.bf16.vlgmr.msrb.gmra.mxu0 %vm2145_vm4, %v2138_v15 }
 0x41b   : > { %2124 = vmatpush.bf16.msra.mxu3 %v2062_v31 }
 0x41c   : > { %v2154_v43 = vsel %vm2149_vm3, %v2135_v51, 0 }
 0x41d   : > { %2182 = vmatpush.bf16.msrb.mxu1 %v2154_v43  ;;  %v2102_v7 = vpop.f32.mrf.mxu1 }
 0x41e   : > { %2720 = vmatmul.msk.bf16.vlgmr.msra.gmra.mxu3 %vm2074_vm2, %v2067_v20 }
 0x420   : > { %2722 = vmatmul.msk.bf16.vlgmr.msrb.gmra.mxu1 %vm2145_vm4, %v2138_v15 }
 0x497   : > { %v2171_v19 = vpop.f32.mrf.mxu0 }
 0x498   : > { %v2172_v6 = vadd.f32 %v2171_v19, %v2143_v23 }
 0x49a   : > { %v2214_v2 = vmax.f32 %v2172_v6, 0.0 }
 0x49b   : > { %v2113_v9 = vpop.f32.mrf.mxu2 }
 0x49c   : > { %v2218_v32 = vpack.c.bf16 %v2214_v2, %v2214_v2  ;;  %v2114_v34 = vadd.f32 %v2113_v9, %v2072_v1 }
 0x49d   : > { %v2184_v8 = vpop.f32.mrf.mxu1 }
 0x49e   : > { %v2132_v13 = vmax.f32 %v2114_v34, 0.0  ;;  %v2185_v12 = vadd.f32 %v2184_v8, %v2143_v23  ;;  %v2233_v26 = vsel %vm690_vm0, %v2218_v32, 0 }
 0x49f   : > { %2251 = vmatpush.bf16.msra.mxu0 %v2233_v26  ;;  %v2173_v38 = vpop.f32.mrf.mxu0 }
 0x4a0   : > { %v2136_v17 = vpack.c.bf16 %v2132_v13, %v2132_v13  ;;  %v2215_v18 = vmax.f32 %v2185_v12, 0.0 }
 0x4a1   : > { %v2126_v48 = vpop.f32.mrf.mxu3 }
 0x4a2   : > { %v2219_v45 = vpack.c.bf16 %v2215_v18, %v2215_v18  ;;  %v2127_v52 = vadd.f32 %v2126_v48, %v2072_v1  ;;  %2725 = vmatmul.msk.bf16.vlgmr.msra.gmra.mxu0 %vm641_vm1, %v2222_v47  ;;  %v2157_v20 = vsel %vm2149_vm3, %v2136_v17, 0  ;;  %v2393_v17 = vlaneseq }
 0x4a3   : > { %2195 = vmatpush.bf16.msrb.mxu2 %v2157_v20  ;;  %v2115_v62 = vpop.f32.mrf.mxu2 }
 0x4a4   : > { %v2133_v35 = vmax.f32 %v2127_v52, 0.0  ;;  %v2236_v30 = vsel %vm690_vm0, %v2219_v45, 0  ;;  %vm2395_vm8 = vcmp.lt.s32.totalorder %v2393_v17, 512 }
 0x4a5   : > { %2264 = vmatpush.bf16.msra.mxu1 %v2236_v30  ;;  %v2186_v54 = vpop.f32.mrf.mxu1 }
 0x4a6   : > { %v2137_v27 = vpack.c.bf16 %v2133_v35, %v2133_v35  ;;  %2723 = vmatmul.msk.bf16.vlgmr.msrb.gmra.mxu2 %vm2145_vm4, %v2138_v15 }
 0x4a8   : > { %2726 = vmatmul.msk.bf16.vlgmr.msra.gmra.mxu1 %vm641_vm1, %v2222_v47  ;;  %v2160_v22 = vsel %vm2149_vm3, %v2137_v27, 0 }
 0x4a9   : > { %2208 = vmatpush.bf16.msrb.mxu3 %v2160_v22  ;;  %v2128_v41 = vpop.f32.mrf.mxu3 }
 0x4ac   : > { %2724 = vmatmul.msk.bf16.vlgmr.msrb.gmra.mxu3 %vm2145_vm4, %v2138_v15 }
 0x51f   : > { %v2253_v16 = vpop.f32.mrf.mxu0 }
 0x520   : > { %v2254_v33 = vadd.f32 %v2253_v16, %v2227_v39 }
 0x522   : > { %v2296_v50 = vmax.f32 %v2254_v33, 0.0 }
 0x524   : > { %v2300_v61 = vpack.c.bf16 %v2296_v50, %v2296_v50 }
 0x525   : > { %v2266_v55 = vpop.f32.mrf.mxu1 }
 0x526   : > { %v2267_v28 = vadd.f32 %v2266_v55, %v2227_v39  ;;  %v2318_v10 = vsel %vm2316_vm5, %v2300_v61, 0 }
 0x527   : > { %2336 = vmatpush.bf16.msrb.mxu0 %v2318_v10  ;;  %v2255_v1 = vpop.f32.mrf.mxu0 }
 0x528   : > { %v2297_v49 = vmax.f32 %v2267_v28, 0.0 }
 0x529   : > { %v2197_v58 = vpop.f32.mrf.mxu2 }
 0x52a   : > { %v2301_v29 = vpack.c.bf16 %v2297_v49, %v2297_v49  ;;  %v2198_v60 = vadd.f32 %v2197_v58, %v2143_v23  ;;  %2729 = vmatmul.msk.bf16.vlgmr.msrb.gmra.mxu0 %vm2312_vm6, %v2304_v57 }
 0x52c   : > { %v2216_v46 = vmax.f32 %v2198_v60, 0.0  ;;  %v2321_v44 = vsel %vm2316_vm5, %v2301_v29, 0 }
 0x52d   : > { %2349 = vmatpush.bf16.msrb.mxu1 %v2321_v44  ;;  %v2268_v11 = vpop.f32.mrf.mxu1 }
 0x52e   : > { %v2220_v4 = vpack.c.bf16 %v2216_v46, %v2216_v46 }
 0x52f   : > { %v2210_v37 = vpop.f32.mrf.mxu3 }
 0x530   : > { %v2211_v42 = vadd.f32 %v2210_v37, %v2143_v23  ;;  %2730 = vmatmul.msk.bf16.vlgmr.msrb.gmra.mxu1 %vm2312_vm6, %v2304_v57  ;;  %v2239_v25 = vsel %vm690_vm0, %v2220_v4, 0 }
 0x531   : > { %2277 = vmatpush.bf16.msra.mxu2 %v2239_v25  ;;  %v2199_v3 = vpop.f32.mrf.mxu2 }
 0x532   : > { %v2217_v21 = vmax.f32 %v2211_v42, 0.0 }
 0x534   : > { %v2221_v53 = vpack.c.bf16 %v2217_v21, %v2217_v21  ;;  %2727 = vmatmul.msk.bf16.vlgmr.msra.gmra.mxu2 %vm641_vm1, %v2222_v47 }
 0x536   : > { %v2242_v5 = vsel %vm690_vm0, %v2221_v53, 0 }
 0x537   : > { %2290 = vmatpush.bf16.msra.mxu3 %v2242_v5  ;;  %v2212_v14 = vpop.f32.mrf.mxu3 }
 0x53a   : > { %2728 = vmatmul.msk.bf16.vlgmr.msra.gmra.mxu3 %vm641_vm1, %v2222_v47 }
 0x5a7   : > { %v2338_v0 = vpop.f32.mrf.mxu0 }
 0x5a8   : > { %v2339_v24 = vadd.f32 %v2338_v0, %v2311_v59 }
 0x5ad   : > { %v2351_v56 = vpop.f32.mrf.mxu1 }
 0x5ae   : > { %v2352_v40 = vadd.f32 %v2351_v56, %v2311_v59 }
 0x5af   : > { %v2340_v15 = vpop.f32.mrf.mxu0 }
 0x5b0   : > { %v2385_v36 = vrot.slane %v2352_v40, 7 }
 0x5b2   : > { %v2388_v31 = vsel %vm2316_vm5, %v2339_v24, %v2385_v36 }
 0x5b5   : > { %v2353_v51 = vpop.f32.mrf.mxu1 }
 0x5b7   : > { %v2279_v43 = vpop.f32.mrf.mxu2 }
 0x5b8   : > { %v2280_v7 = vadd.f32 %v2279_v43, %v2227_v39 }
 0x5ba   : > { %v2298_v23 = vmax.f32 %v2280_v7, 0.0 }
 0x5bc   : > { %v2302_v19 = vpack.c.bf16 %v2298_v23, %v2298_v23 }
 0x5bd   : > { %v2292_v6 = vpop.f32.mrf.mxu3 }
 0x5be   : > { %v2293_v2 = vadd.f32 %v2292_v6, %v2227_v39  ;;  %v2324_v9 = vsel %vm2316_vm5, %v2302_v19, 0 }
 0x5bf   : > { %2362 = vmatpush.bf16.msrb.mxu2 %v2324_v9  ;;  %v2281_v32 = vpop.f32.mrf.mxu2 }
 0x5c0   : > { %v2299_v34 = vmax.f32 %v2293_v2, 0.0 }
 0x5c2   : > { %v2303_v8 = vpack.c.bf16 %v2299_v34, %v2299_v34  ;;  %2731 = vmatmul.msk.bf16.vlgmr.msrb.gmra.mxu2 %vm2312_vm6, %v2304_v57 }
 0x5c4   : > { %v2327_v13 = vsel %vm2316_vm5, %v2303_v8, 0 }
 0x5c5   : > { %2375 = vmatpush.bf16.msrb.mxu3 %v2327_v13  ;;  %v2294_v12 = vpop.f32.mrf.mxu3 }
 0x5c8   : > { %2732 = vmatmul.msk.bf16.vlgmr.msrb.gmra.mxu3 %vm2312_vm6, %v2304_v57 }
 0x645   : > { %v2364_v26 = vpop.f32.mrf.mxu2 }
 0x646   : > { %v2365_v47 = vadd.f32 %v2364_v26, %v2311_v59 }
 0x648   : > { %v2386_v45 = vrot.slane %v2365_v47, 6 }
 0x64b   : > { %v2377_v38 = vpop.f32.mrf.mxu3 }
 0x64c   : > { %v2378_v18 = vadd.f32 %v2377_v38, %v2311_v59 }
 0x64d   : > { %v2366_v48 = vpop.f32.mrf.mxu2 }
 0x64e   : > { %v2387_v52 = vrot.slane %v2378_v18, 5 }
 0x650   : > { %v2390_v20 = vsel %vm2389_vm7, %v2386_v45, %v2387_v52 }
 0x651   : > { %v2391_v62 = vsel %vm690_vm0, %v2388_v31, %v2390_v20 }
 0x652   : > { %2397 = vst.msk [vmem:[%s513_s20] sm:$0xf] %vm2395_vm8, %v2391_v62 }
 0x653   : > { %v2379_v35 = vpop.f32.mrf.mxu3 }
 0x654   : > { %2966 = shalt.err (!%p2963_p8)
}
 0x655   : > { %2783 = dma.vmem_to_hbm [thread:$0]  (%p3135_p5), %s2412_s13, 64, %s2414_s25, %s2399_s2  }
 0x656 PF: > { %s4124_s23 = sld [smem:[#allocation15_spill]] }
 0x657   : > { %s4125_s22 = sld [smem:[#allocation13_spill]] }
 0x65c   : > { %p2805_p9 = scmp.ge.s32.totalorder %s4124_s23, 2 }
 0x65d   : > { %s2425_s15 = sand.u32 1, %s4125_s22  }
 0x65e   : > { %p2796_p10 = pnand %p2805_p9, %p3139_p6  ;;  %s2426_s17 = scalar_lea.sflag [#allocation5], %s2425_s15 }
 0x660   : > { %p2797_p11 = pneg %p2796_p10 }
 0x662   : > { %2992 = dma.done.wait (%p2797_p11), %s2426_s17, 64  }
 0x663   : > { %2994 = vsyncadd (%p2797_p11), %s2426_s17, 4294967232  ;;  %s4127_s18 = sld [smem:[#allocation16_spill]]  ;;  %s4130_s15 = smov %s3001_s16 }
 0x664   : > { %s4128_s20 = sld [smem:[#allocation14_spill]] }
 0x665   : > { %s4129_s17 = sld [smem:[#allocation17_spill]] }
 0x669   : > { %p28_p12 = scmp.ge.s32.totalorder %s4127_s18, 4  }
 0x66a   : > { %s4131_s16 = smov %s4128_s20 }
 0x66b   :  { %30 = sbr.rel (!%p28_p12) target bundleno = 8 (0x8), region = 124 }
 0x670   :  { %2432 = vsyncpa [#allocation4], 1 }
 0x671   :  { %2434 = vsyncpa [#allocation4 + $0x1], 1 }
 0x672   :  { %2435 = vsyncpa [#allocation7], 1 }
 0x673   :  { %2436 = vsyncpa [#allocation5], 1 }
 0x674   :  { %2438 = vsyncpa [#allocation5 + $0x1], 1 }

</bundles_post_ra>
